<compile_context>
chip_gen: v6e
topology: v6e:2x2x1
jax: 0.10.0
libtpu: 0.0.40
codegen_flags: <defaults>
</compile_context>

<pallas_src>
import jax
import jax.numpy as jnp
import numpy as np
from jax.experimental import pallas as pl
from jax.experimental.pallas import tpu as pltpu

# ---- model hyper-parameters (small, synthetic) ----
BATCH = 2
SEQ = 8
D_MODEL = 32
HEADS = 4
D_FF = 64
KSIZE = 7            # conformer conv kernel size
BT = BATCH * SEQ     # flattened (batch*time) rows

LN_EPS = 1e-5        # nn.LayerNorm default (norm_ffn1/mha/conv/ffn2, conv-module LN)
FFN_LN_EPS = 1e-6    # PositionwiseFeedForward(norm_eps=1e-6) internal LN
NEG_INF = -1e18

# Row indices inside the packed per-channel vector table (shape (22, D)).
(R_FFN1_LN_G, R_FFN1_LN_B, R_G_FFN1, R_B_FFN1,
 R_G_MHA, R_B_MHA, R_BQ, R_BK, R_BV, R_BO,
 R_G_CONV, R_B_CONV, R_PW1_B0, R_PW1_B1, R_DW_B,
 R_LNC_G, R_LNC_B, R_PW2_B,
 R_G_FFN2, R_B_FFN2, R_FFN2_LN_G, R_FFN2_LN_B) = range(22)
N_VEC_ROWS = 22


def _layer_norm(x, gamma, beta, eps):
    mean = jnp.mean(x, axis=-1, keepdims=True)
    var = jnp.mean((x - mean) ** 2, axis=-1, keepdims=True)
    return (x - mean) * jax.lax.rsqrt(var + eps) * gamma + beta


# =============================== Pallas kernel ===============================
def conformer_kernel(
    x_ref, bias_ref, vecs_ref,
    wqkv_ref, wo_ref,
    ffn1_w1_ref, ffn1_w2_ref,
    pw1_w_ref, dw_w_ref, pw2_w_ref,
    ffn2_w1_ref, ffn2_w2_ref,
    o_ref,
):
    x = x_ref[...]            # (BT, D) — whole batch, flattened, channels-last
    V = vecs_ref[...]         # (22, D) packed per-channel vectors

    def row(i):               # (1, D) row, broadcasts over the BT rows
        return V[i:i + 1, :]

    def ffn_block(xn, w1_ref, w2_ref, g, b):
        # PositionwiseFeedForward (pre-norm eps 1e-6, internal residual, no biases)
        h = _layer_norm(xn, g, b, FFN_LN_EPS)
        h = jnp.maximum(
            jnp.dot(h, w1_ref[...], preferred_element_type=jnp.float32), 0.0)
        return jnp.dot(h, w2_ref[...], preferred_element_type=jnp.float32) + xn

    # ----------------- half-step FFN #1 -----------------
    res = x
    xn = _layer_norm(x, row(R_G_FFN1), row(R_B_FFN1), LN_EPS)
    x = res + 0.5 * ffn_block(xn, ffn1_w1_ref, ffn1_w2_ref,
                              row(R_FFN1_LN_G), row(R_FFN1_LN_B))

    # ----------------- multi-head self-attention -----------------
    res = x
    h = _layer_norm(x, row(R_G_MHA), row(R_B_MHA), LN_EPS)
    # fused QKV projection: one MXU issue instead of three
    qkv = jnp.dot(h, wqkv_ref[...], preferred_element_type=jnp.float32)   # (BT, 3D)
    q = qkv[:, 0 * D_MODEL:1 * D_MODEL] + row(R_BQ)
    k = qkv[:, 1 * D_MODEL:2 * D_MODEL] + row(R_BK)
    v = qkv[:, 2 * D_MODEL:3 * D_MODEL] + row(R_BV)

    # precomputed additive bias: 0 for (same batch & unpadded key), -1e18 otherwise
    bias = bias_ref[...]                                                  # (BT, BT)

    dk = D_MODEL // HEADS
    scale = 1.0 / float(np.sqrt(dk))
    attn_out = jnp.zeros_like(x) + row(R_BO)      # fold output-proj bias here
    for hh in range(HEADS):                       # static unroll over heads
        lo = hh * dk
        qh = q[:, lo:lo + dk]
        kh = k[:, lo:lo + dk]
        vh = v[:, lo:lo + dk]
        s = jnp.dot(qh, kh.T, preferred_element_type=jnp.float32) * scale + bias
        s = s - jnp.max(s, axis=-1, keepdims=True)
        p = jnp.exp(s)
        p = p * pl.reciprocal(jnp.sum(p, axis=-1, keepdims=True), approx=True)
        ctx = jnp.dot(p, vh, preferred_element_type=jnp.float32)          # (BT, dk)
        # fold output projection into the head loop (no lane concat of heads)
        attn_out = attn_out + jnp.dot(ctx, wo_ref[lo:lo + dk, :],
                                      preferred_element_type=jnp.float32)
    x = res + attn_out

    # ----------------- conformer convolution module -----------------
    res = x
    h = _layer_norm(x, row(R_G_CONV), row(R_B_CONV), LN_EPS)
    # pointwise conv 1 (kernel-size-1 conv == matmul over channels) + GLU
    y = jnp.dot(h, pw1_w_ref[...], preferred_element_type=jnp.float32)    # (BT, 2D)
    glu = (y[:, :D_MODEL] + row(R_PW1_B0)) * \
        jax.nn.sigmoid(y[:, D_MODEL:] + row(R_PW1_B1))                    # (BT, D)

    # depthwise conv via XLU rolls on the flattened (BT, D) slab.  Edge masks
    # implement the zero padding (K//2) AND prevent leakage across the batch
    # boundary (both correspond to t + shift falling outside [0, T)).
    dw = dw_w_ref[...]                                                    # (K, D)
    t_idx = jax.lax.broadcasted_iota(jnp.int32, (BT, 1), 0) % SEQ         # (BT, 1)
    acc = jnp.zeros_like(glu) + row(R_DW_B)
    for kk in range(KSIZE):
        s_off = kk - KSIZE // 2                   # static shift in [-3, 3]
        if s_off == 0:
            shifted = glu
        else:
            shifted = pltpu.roll(glu, (-s_off) % BT, axis=0)
            if s_off < 0:
                shifted = jnp.where(t_idx >= -s_off, shifted, 0.0)
            else:
                shifted = jnp.where(t_idx < SEQ - s_off, shifted, 0.0)
        acc = acc + shifted * dw[kk:kk + 1, :]

    # conv-module layer norm + SiLU + pointwise conv 2
    c = _layer_norm(acc, row(R_LNC_G), row(R_LNC_B), LN_EPS)
    c = c * jax.nn.sigmoid(c)
    x = res + jnp.dot(c, pw2_w_ref[...],
                      preferred_element_type=jnp.float32) + row(R_PW2_B)

    # ----------------- half-step FFN #2 -----------------
    res = x
    xn = _layer_norm(x, row(R_G_FFN2), row(R_B_FFN2), LN_EPS)
    x = res + 0.5 * ffn_block(xn, ffn2_w1_ref, ffn2_w2_ref,
                              row(R_FFN2_LN_G), row(R_FFN2_LN_B))

    # single contiguous output store
    o_ref[...] = x.astype(o_ref.dtype)


# =============================== wrapper ===============================
def _build_attn_bias(mask, B, T):
    """(B*T, B*T) additive bias: 0 where key is in the same batch row and not
    padded, NEG_INF otherwise (block-diagonal + key-padding mask)."""
    key_pad = mask.reshape(B * T) > 0.5                       # True = padded key
    batch_ids = jnp.arange(B * T) // T
    same_batch = batch_ids[:, None] == batch_ids[None, :]
    valid = same_batch & (~key_pad)[None, :]
    return jnp.where(valid, 0.0, NEG_INF).astype(jnp.float32)


def conformer_layer_pallas(x, mask, params):
    B, T, D = x.shape
    p = params

    # fused QKV weight (in, 3*out) and packed per-channel vector table
    wqkv = jnp.concatenate([p["wq"].T, p["wk"].T, p["wv"].T], axis=1)      # (D, 3D)
    vec_rows = [
        p["ffn1_ln_g"], p["ffn1_ln_b"], p["g_ffn1"], p["b_ffn1"],
        p["g_mha"], p["b_mha"], p["bq"], p["bk"], p["bv"], p["bo"],
        p["g_conv"], p["b_conv"], p["pw1_b"][:, :D], p["pw1_b"][:, D:],
        p["dw_b"], p["lnc_g"], p["lnc_b"], p["pw2_b"],
        p["g_ffn2"], p["b_ffn2"], p["ffn2_ln_g"], p["ffn2_ln_b"],
    ]
    vecs = jnp.concatenate(vec_rows, axis=0).astype(jnp.float32)           # (22, D)
    assert vecs.shape == (N_VEC_ROWS, D)

    operands = [
        x.reshape(B * T, D).astype(jnp.float32),   # flattened activations
        _build_attn_bias(mask, B, T),              # precomputed attention bias
        vecs,                                      # packed gammas/betas/biases
        wqkv,                                      # (D, 3D)
        p["wo"].T,                                 # (D, D)
        p["ffn1_w1"].T, p["ffn1_w2"].T,            # (D, D_FF), (D_FF, D)
        p["pw1_w"].T,                              # (D, 2D)
        p["dw_w"].T,                               # (K, D)  lane-contiguous taps
        p["pw2_w"].T,                              # (D, D)
        p["ffn2_w1"].T, p["ffn2_w2"].T,            # (D, D_FF), (D_FF, D)
    ]

    # single grid step: whole (small) problem lives in VMEM; full-array blocks
    in_specs = [pl.BlockSpec(a.shape, lambda i, n=a.ndim: (0,) * n) for a in operands]

    out = pl.pallas_call(
        conformer_kernel,
        out_shape=jax.ShapeDtypeStruct((B * T, D), jnp.float32),
        grid_spec=pltpu.PrefetchScalarGridSpec(
            num_scalar_prefetch=0,
            grid=(1,),
            in_specs=in_specs,
            out_specs=pl.BlockSpec((B * T, D), lambda i: (0, 0)),
        ),
        compiler_params=pltpu.CompilerParams(dimension_semantics=("arbitrary",)),
    )(*operands)
    return out.reshape(B, T, D)


# =============================== pure-JAX reference ===============================
def conformer_ref(x, mask, p):
    B, T, D = x.shape

    def ffn(xn, w1, w2, g, b):
        h = _layer_norm(xn, g[0], b[0], FFN_LN_EPS)
        h = jnp.maximum(jnp.einsum("btd,fd->btf", h, w1), 0.0)
        return jnp.einsum("btf,df->btd", h, w2) + xn

    res = x
    xn = _layer_norm(x, p["g_ffn1"][0], p["b_ffn1"][0], LN_EPS)
    x = res + 0.5 * ffn(xn, p["ffn1_w1"], p["ffn1_w2"], p["ffn1_ln_g"], p["ffn1_ln_b"])

    res = x
    h = _layer_norm(x, p["g_mha"][0], p["b_mha"][0], LN_EPS)
    q = h @ p["wq"].T + p["bq"][0]
    k = h @ p["wk"].T + p["bk"][0]
    v = h @ p["wv"].T + p["bv"][0]
    dk = D // HEADS
    split = lambda z: z.reshape(B, T, HEADS, dk).transpose(0, 2, 1, 3)
    qh, kh, vh = split(q), split(k), split(v)
    scores = jnp.einsum("bhqd,bhkd->bhqk", qh, kh) * (1.0 / float(np.sqrt(dk)))
    scores = jnp.where(mask[:, None, :, :] > 0.5, NEG_INF, scores)
    scores = scores - jnp.max(scores, -1, keepdims=True)
    pa = jnp.exp(scores)
    pa = pa / jnp.sum(pa, -1, keepdims=True)
    ctx = jnp.einsum("bhqk,bhkd->bhqd", pa, vh).transpose(0, 2, 1, 3).reshape(B, T, D)
    x = res + ctx @ p["wo"].T + p["bo"][0]

    res = x
    h = _layer_norm(x, p["g_conv"][0], p["b_conv"][0], LN_EPS)
    y = h @ p["pw1_w"].T + p["pw1_b"][0]
    glu = y[..., :D] * jax.nn.sigmoid(y[..., D:])
    padded = jnp.pad(glu, ((0, 0), (KSIZE // 2, KSIZE // 2), (0, 0)))
    acc = jnp.zeros_like(glu) + p["dw_b"][0]
    for kk in range(KSIZE):
        acc = acc + padded[:, kk:kk + T, :] * p["dw_w"][:, kk][None, None, :]
    c = _layer_norm(acc, p["lnc_g"][0], p["lnc_b"][0], LN_EPS)
    c = c * jax.nn.sigmoid(c)
    x = res + c @ p["pw2_w"].T + p["pw2_b"][0]

    res = x
    xn = _layer_norm(x, p["g_ffn2"][0], p["b_ffn2"][0], LN_EPS)
    x = res + 0.5 * ffn(xn, p["ffn2_w1"], p["ffn2_w2"], p["ffn2_ln_g"], p["ffn2_ln_b"])
    return x


# =============================== parameter init ===============================
def init_params(key):
    keys = iter(jax.random.split(key, 40))

    def nrm(shape, scale):
        return (scale * jax.random.normal(next(keys), shape)).astype(jnp.float32)

    def gamma():
        return (1.0 + 0.05 * jax.random.normal(next(keys), (1, D_MODEL))).astype(jnp.float32)

    def beta():
        return nrm((1, D_MODEL), 0.02)

    p = {}
    p["ffn1_w1"] = nrm((D_FF, D_MODEL), 0.1)
    p["ffn1_w2"] = nrm((D_MODEL, D_FF), 0.1)
    p["ffn1_ln_g"], p["ffn1_ln_b"] = gamma(), beta()
    p["g_ffn1"], p["b_ffn1"] = gamma(), beta()
    for n in ["wq", "wk", "wv", "wo"]:
        p[n] = nrm((D_MODEL, D_MODEL), 0.1)
    for n in ["bq", "bk", "bv", "bo"]:
        p[n] = nrm((1, D_MODEL), 0.02)
    p["g_mha"], p["b_mha"] = gamma(), beta()
    p["g_conv"], p["b_conv"] = gamma(), beta()
    p["pw1_w"] = nrm((2 * D_MODEL, D_MODEL), 0.1)
    p["pw1_b"] = nrm((1, 2 * D_MODEL), 0.02)
    p["dw_w"] = nrm((D_MODEL, KSIZE), 0.1)     # PyTorch (D,1,K) squeezed to (D,K)
    p["dw_b"] = nrm((1, D_MODEL), 0.02)
    p["lnc_g"], p["lnc_b"] = gamma(), beta()
    p["pw2_w"] = nrm((D_MODEL, D_MODEL), 0.1)
    p["pw2_b"] = nrm((1, D_MODEL), 0.02)
    p["ffn2_w1"] = nrm((D_FF, D_MODEL), 0.1)
    p["ffn2_w2"] = nrm((D_MODEL, D_FF), 0.1)
    p["ffn2_ln_g"], p["ffn2_ln_b"] = gamma(), beta()
    p["g_ffn2"], p["b_ffn2"] = gamma(), beta()
    return p


if __name__ == "__main__":
    key = jax.random.PRNGKey(0)
    kx, kp = jax.random.split(key)
    x = jax.random.normal(kx, (BATCH, SEQ, D_MODEL), dtype=jnp.float32)

    # key-padding mask (B, 1, T); 1.0 => padded position (masked out)
    lengths = jnp.array([SEQ, SEQ - 3], dtype=jnp.int32)
    mask = (jnp.arange(SEQ)[None, :] >= lengths[:, None]).astype(jnp.float32)[:, None, :]

    params = init_params(kp)

    out = conformer_layer_pallas(x, mask, params)
    jax.block_until_ready(out)

    ref = conformer_ref(x, mask, params)
    np.testing.assert_allclose(np.asarray(out), np.asarray(ref), rtol=1e-2, atol=1e-2)

    print("KERNEL_OK")
</pallas_src>

<mosaic_0001>
module attributes {stable_mosaic.version = 11 : i64} {
  func.func @conformer_kernel(%arg0: i32, %arg1: memref<16x32xf32, #tpu.memory_space<vmem>>, %arg2: memref<16x16xf32, #tpu.memory_space<vmem>>, %arg3: memref<22x32xf32, #tpu.memory_space<vmem>>, %arg4: memref<32x96xf32, #tpu.memory_space<vmem>>, %arg5: memref<32x32xf32, #tpu.memory_space<vmem>>, %arg6: memref<32x64xf32, #tpu.memory_space<vmem>>, %arg7: memref<64x32xf32, #tpu.memory_space<vmem>>, %arg8: memref<32x64xf32, #tpu.memory_space<vmem>>, %arg9: memref<7x32xf32, #tpu.memory_space<vmem>>, %arg10: memref<32x32xf32, #tpu.memory_space<vmem>>, %arg11: memref<32x64xf32, #tpu.memory_space<vmem>>, %arg12: memref<64x32xf32, #tpu.memory_space<vmem>>, %arg13: memref<16x32xf32, #tpu.memory_space<vmem>>) attributes {dimension_semantics = [#tpu.dimension_semantics<arbitrary>], iteration_bounds = array<i64: 1>, scalar_prefetch = 0 : i64, scratch_operands = 0 : i64, tpu.core_type = #tpu.core_type<tc>, window_params = [{pipeline_mode = #tpu.pipeline_mode<synchronous>, transform_indices = @transform_0, window_bounds = array<i64: 16, 32>}, {pipeline_mode = #tpu.pipeline_mode<synchronous>, transform_indices = @transform_1, window_bounds = array<i64: 16, 16>}, {pipeline_mode = #tpu.pipeline_mode<synchronous>, transform_indices = @transform_2, window_bounds = array<i64: 22, 32>}, {pipeline_mode = #tpu.pipeline_mode<synchronous>, transform_indices = @transform_3, window_bounds = array<i64: 32, 96>}, {pipeline_mode = #tpu.pipeline_mode<synchronous>, transform_indices = @transform_4, window_bounds = array<i64: 32, 32>}, {pipeline_mode = #tpu.pipeline_mode<synchronous>, transform_indices = @transform_5, window_bounds = array<i64: 32, 64>}, {pipeline_mode = #tpu.pipeline_mode<synchronous>, transform_indices = @transform_6, window_bounds = array<i64: 64, 32>}, {pipeline_mode = #tpu.pipeline_mode<synchronous>, transform_indices = @transform_7, window_bounds = array<i64: 32, 64>}, {pipeline_mode = #tpu.pipeline_mode<synchronous>, transform_indices = @transform_8, window_bounds = array<i64: 7, 32>}, {pipeline_mode = #tpu.pipeline_mode<synchronous>, transform_indices = @transform_9, window_bounds = array<i64: 32, 32>}, {pipeline_mode = #tpu.pipeline_mode<synchronous>, transform_indices = @transform_10, window_bounds = array<i64: 32, 64>}, {pipeline_mode = #tpu.pipeline_mode<synchronous>, transform_indices = @transform_11, window_bounds = array<i64: 64, 32>}, {pipeline_mode = #tpu.pipeline_mode<synchronous>, transform_indices = @transform_12, window_bounds = array<i64: 16, 32>}]} {
    %c0 = arith.constant 0 : index
    %c0_0 = arith.constant 0 : index
    %0 = vector.load %arg1[%c0, %c0_0] : memref<16x32xf32, #tpu.memory_space<vmem>>, vector<16x32xf32>
    %c0_1 = arith.constant 0 : index
    %c0_2 = arith.constant 0 : index
    %1 = vector.load %arg3[%c0_1, %c0_2] : memref<22x32xf32, #tpu.memory_space<vmem>>, vector<22x32xf32>
    %2 = vector.extract_strided_slice %1 {offsets = [2, 0], sizes = [1, 32], strides = [1, 1]} : vector<22x32xf32> to vector<1x32xf32>
    %3 = vector.extract_strided_slice %1 {offsets = [3, 0], sizes = [1, 32], strides = [1, 1]} : vector<22x32xf32> to vector<1x32xf32>
    %cst = arith.constant dense<0.000000e+00> : vector<16xf32>
    %4 = vector.multi_reduction <add>, %0, %cst [1] : vector<16x32xf32> to vector<16xf32>
    %5 = vector.shape_cast %4 : vector<16xf32> to vector<16x1xf32>
    %cst_3 = arith.constant 3.200000e+01 : f32
    %6 = vector.broadcast %cst_3 : f32 to vector<16x1xf32>
    %7 = arith.divf %5, %6 : vector<16x1xf32>
    %8 = vector.broadcast %7 : vector<16x1xf32> to vector<16x32xf32>
    %9 = arith.subf %0, %8 : vector<16x32xf32>
    %10 = arith.mulf %9, %9 : vector<16x32xf32>
    %cst_4 = arith.constant dense<0.000000e+00> : vector<16xf32>
    %11 = vector.multi_reduction <add>, %10, %cst_4 [1] : vector<16x32xf32> to vector<16xf32>
    %12 = vector.shape_cast %11 : vector<16xf32> to vector<16x1xf32>
    %cst_5 = arith.constant 3.200000e+01 : f32
    %13 = vector.broadcast %cst_5 : f32 to vector<16x1xf32>
    %14 = arith.divf %12, %13 : vector<16x1xf32>
    %15 = vector.broadcast %7 : vector<16x1xf32> to vector<16x32xf32>
    %16 = arith.subf %0, %15 : vector<16x32xf32>
    %cst_6 = arith.constant 9.99999974E-6 : f32
    %17 = vector.broadcast %cst_6 : f32 to vector<16x1xf32>
    %18 = arith.addf %14, %17 : vector<16x1xf32>
    %19 = math.rsqrt %18 : vector<16x1xf32>
    %20 = vector.broadcast %19 : vector<16x1xf32> to vector<16x32xf32>
    %21 = arith.mulf %16, %20 : vector<16x32xf32>
    %22 = vector.broadcast %2 : vector<1x32xf32> to vector<16x32xf32>
    %23 = arith.mulf %21, %22 : vector<16x32xf32>
    %24 = vector.broadcast %3 : vector<1x32xf32> to vector<16x32xf32>
    %25 = arith.addf %23, %24 : vector<16x32xf32>
    %26 = vector.extract_strided_slice %1 {offsets = [0, 0], sizes = [1, 32], strides = [1, 1]} : vector<22x32xf32> to vector<1x32xf32>
    %27 = vector.extract_strided_slice %1 {offsets = [1, 0], sizes = [1, 32], strides = [1, 1]} : vector<22x32xf32> to vector<1x32xf32>
    %cst_7 = arith.constant dense<0.000000e+00> : vector<16xf32>
    %28 = vector.multi_reduction <add>, %25, %cst_7 [1] : vector<16x32xf32> to vector<16xf32>
    %29 = vector.shape_cast %28 : vector<16xf32> to vector<16x1xf32>
    %cst_8 = arith.constant 3.200000e+01 : f32
    %30 = vector.broadcast %cst_8 : f32 to vector<16x1xf32>
    %31 = arith.divf %29, %30 : vector<16x1xf32>
    %32 = vector.broadcast %31 : vector<16x1xf32> to vector<16x32xf32>
    %33 = arith.subf %25, %32 : vector<16x32xf32>
    %34 = arith.mulf %33, %33 : vector<16x32xf32>
    %cst_9 = arith.constant dense<0.000000e+00> : vector<16xf32>
    %35 = vector.multi_reduction <add>, %34, %cst_9 [1] : vector<16x32xf32> to vector<16xf32>
    %36 = vector.shape_cast %35 : vector<16xf32> to vector<16x1xf32>
    %cst_10 = arith.constant 3.200000e+01 : f32
    %37 = vector.broadcast %cst_10 : f32 to vector<16x1xf32>
    %38 = arith.divf %36, %37 : vector<16x1xf32>
    %39 = vector.broadcast %31 : vector<16x1xf32> to vector<16x32xf32>
    %40 = arith.subf %25, %39 : vector<16x32xf32>
    %cst_11 = arith.constant 9.99999997E-7 : f32
    %41 = vector.broadcast %cst_11 : f32 to vector<16x1xf32>
    %42 = arith.addf %38, %41 : vector<16x1xf32>
    %43 = math.rsqrt %42 : vector<16x1xf32>
    %44 = vector.broadcast %43 : vector<16x1xf32> to vector<16x32xf32>
    %45 = arith.mulf %40, %44 : vector<16x32xf32>
    %46 = vector.broadcast %26 : vector<1x32xf32> to vector<16x32xf32>
    %47 = arith.mulf %45, %46 : vector<16x32xf32>
    %48 = vector.broadcast %27 : vector<1x32xf32> to vector<16x32xf32>
    %49 = arith.addf %47, %48 : vector<16x32xf32>
    %c0_12 = arith.constant 0 : index
    %c0_13 = arith.constant 0 : index
    %50 = vector.load %arg6[%c0_12, %c0_13] : memref<32x64xf32, #tpu.memory_space<vmem>>, vector<32x64xf32>
    %cst_14 = arith.constant dense<0.000000e+00> : vector<16x64xf32>
    %51 = tpu.matmul %49, %50, %cst_14 {dimension_numbers = #tpu.dot_dimension_numbers<[1], [0], [0], [1], [0, 0, 1, 1], [], []>} : vector<16x32xf32>, vector<32x64xf32>, vector<16x64xf32> -> vector<16x64xf32>
    %cst_15 = arith.constant 0.000000e+00 : f32
    %52 = vector.broadcast %cst_15 : f32 to vector<16x64xf32>
    %53 = arith.maximumf %51, %52 : vector<16x64xf32>
    %c0_16 = arith.constant 0 : index
    %c0_17 = arith.constant 0 : index
    %54 = vector.load %arg7[%c0_16, %c0_17] : memref<64x32xf32, #tpu.memory_space<vmem>>, vector<64x32xf32>
    %cst_18 = arith.constant dense<0.000000e+00> : vector<16x32xf32>
    %55 = tpu.matmul %53, %54, %cst_18 {dimension_numbers = #tpu.dot_dimension_numbers<[1], [0], [0], [1], [0, 0, 1, 1], [], []>} : vector<16x64xf32>, vector<64x32xf32>, vector<16x32xf32> -> vector<16x32xf32>
    %56 = arith.addf %55, %25 : vector<16x32xf32>
    %cst_19 = arith.constant 5.000000e-01 : f32
    %57 = vector.broadcast %cst_19 : f32 to vector<16x32xf32>
    %58 = arith.mulf %57, %56 : vector<16x32xf32>
    %59 = arith.addf %0, %58 : vector<16x32xf32>
    %60 = vector.extract_strided_slice %1 {offsets = [4, 0], sizes = [1, 32], strides = [1, 1]} : vector<22x32xf32> to vector<1x32xf32>
    %61 = vector.extract_strided_slice %1 {offsets = [5, 0], sizes = [1, 32], strides = [1, 1]} : vector<22x32xf32> to vector<1x32xf32>
    %cst_20 = arith.constant dense<0.000000e+00> : vector<16xf32>
    %62 = vector.multi_reduction <add>, %59, %cst_20 [1] : vector<16x32xf32> to vector<16xf32>
    %63 = vector.shape_cast %62 : vector<16xf32> to vector<16x1xf32>
    %cst_21 = arith.constant 3.200000e+01 : f32
    %64 = vector.broadcast %cst_21 : f32 to vector<16x1xf32>
    %65 = arith.divf %63, %64 : vector<16x1xf32>
    %66 = vector.broadcast %65 : vector<16x1xf32> to vector<16x32xf32>
    %67 = arith.subf %59, %66 : vector<16x32xf32>
    %68 = arith.mulf %67, %67 : vector<16x32xf32>
    %cst_22 = arith.constant dense<0.000000e+00> : vector<16xf32>
    %69 = vector.multi_reduction <add>, %68, %cst_22 [1] : vector<16x32xf32> to vector<16xf32>
    %70 = vector.shape_cast %69 : vector<16xf32> to vector<16x1xf32>
    %cst_23 = arith.constant 3.200000e+01 : f32
    %71 = vector.broadcast %cst_23 : f32 to vector<16x1xf32>
    %72 = arith.divf %70, %71 : vector<16x1xf32>
    %73 = vector.broadcast %65 : vector<16x1xf32> to vector<16x32xf32>
    %74 = arith.subf %59, %73 : vector<16x32xf32>
    %cst_24 = arith.constant 9.99999974E-6 : f32
    %75 = vector.broadcast %cst_24 : f32 to vector<16x1xf32>
    %76 = arith.addf %72, %75 : vector<16x1xf32>
    %77 = math.rsqrt %76 : vector<16x1xf32>
    %78 = vector.broadcast %77 : vector<16x1xf32> to vector<16x32xf32>
    %79 = arith.mulf %74, %78 : vector<16x32xf32>
    %80 = vector.broadcast %60 : vector<1x32xf32> to vector<16x32xf32>
    %81 = arith.mulf %79, %80 : vector<16x32xf32>
    %82 = vector.broadcast %61 : vector<1x32xf32> to vector<16x32xf32>
    %83 = arith.addf %81, %82 : vector<16x32xf32>
    %c0_25 = arith.constant 0 : index
    %c0_26 = arith.constant 0 : index
    %84 = vector.load %arg4[%c0_25, %c0_26] : memref<32x96xf32, #tpu.memory_space<vmem>>, vector<32x96xf32>
    %cst_27 = arith.constant dense<0.000000e+00> : vector<16x96xf32>
    %85 = tpu.matmul %83, %84, %cst_27 {dimension_numbers = #tpu.dot_dimension_numbers<[1], [0], [0], [1], [0, 0, 1, 1], [], []>} : vector<16x32xf32>, vector<32x96xf32>, vector<16x96xf32> -> vector<16x96xf32>
    %86 = vector.extract_strided_slice %85 {offsets = [0, 0], sizes = [16, 32], strides = [1, 1]} : vector<16x96xf32> to vector<16x32xf32>
    %87 = vector.extract_strided_slice %1 {offsets = [6, 0], sizes = [1, 32], strides = [1, 1]} : vector<22x32xf32> to vector<1x32xf32>
    %88 = vector.broadcast %87 : vector<1x32xf32> to vector<16x32xf32>
    %89 = arith.addf %86, %88 : vector<16x32xf32>
    %90 = vector.extract_strided_slice %85 {offsets = [0, 32], sizes = [16, 32], strides = [1, 1]} : vector<16x96xf32> to vector<16x32xf32>
    %91 = vector.extract_strided_slice %1 {offsets = [7, 0], sizes = [1, 32], strides = [1, 1]} : vector<22x32xf32> to vector<1x32xf32>
    %92 = vector.broadcast %91 : vector<1x32xf32> to vector<16x32xf32>
    %93 = arith.addf %90, %92 : vector<16x32xf32>
    %94 = vector.extract_strided_slice %85 {offsets = [0, 64], sizes = [16, 32], strides = [1, 1]} : vector<16x96xf32> to vector<16x32xf32>
    %95 = vector.extract_strided_slice %1 {offsets = [8, 0], sizes = [1, 32], strides = [1, 1]} : vector<22x32xf32> to vector<1x32xf32>
    %96 = vector.broadcast %95 : vector<1x32xf32> to vector<16x32xf32>
    %97 = arith.addf %94, %96 : vector<16x32xf32>
    %c0_28 = arith.constant 0 : index
    %c0_29 = arith.constant 0 : index
    %98 = vector.load %arg2[%c0_28, %c0_29] : memref<16x16xf32, #tpu.memory_space<vmem>>, vector<16x16xf32>
    %cst_30 = arith.constant 0.000000e+00 : f32
    %99 = vector.broadcast %cst_30 : f32 to vector<16x32xf32>
    %100 = vector.extract_strided_slice %1 {offsets = [9, 0], sizes = [1, 32], strides = [1, 1]} : vector<22x32xf32> to vector<1x32xf32>
    %101 = vector.broadcast %100 : vector<1x32xf32> to vector<16x32xf32>
    %102 = arith.addf %99, %101 : vector<16x32xf32>
    %103 = vector.extract_strided_slice %89 {offsets = [0, 0], sizes = [16, 8], strides = [1, 1]} : vector<16x32xf32> to vector<16x8xf32>
    %104 = vector.extract_strided_slice %93 {offsets = [0, 0], sizes = [16, 8], strides = [1, 1]} : vector<16x32xf32> to vector<16x8xf32>
    %105 = vector.extract_strided_slice %97 {offsets = [0, 0], sizes = [16, 8], strides = [1, 1]} : vector<16x32xf32> to vector<16x8xf32>
    %106 = tpu.transpose %104, [1, 0] : vector<16x8xf32> -> vector<8x16xf32>
    %cst_31 = arith.constant dense<0.000000e+00> : vector<16x16xf32>
    %107 = tpu.matmul %103, %106, %cst_31 {dimension_numbers = #tpu.dot_dimension_numbers<[1], [0], [0], [1], [0, 0, 1, 1], [], []>} : vector<16x8xf32>, vector<8x16xf32>, vector<16x16xf32> -> vector<16x16xf32>
    %cst_32 = arith.constant 0.353553385 : f32
    %108 = vector.broadcast %cst_32 : f32 to vector<16x16xf32>
    %109 = arith.mulf %107, %108 : vector<16x16xf32>
    %110 = arith.addf %109, %98 : vector<16x16xf32>
    %cst_33 = arith.constant dense<0xFF800000> : vector<16xf32>
    %111 = vector.multi_reduction <maximumf>, %110, %cst_33 [1] : vector<16x16xf32> to vector<16xf32>
    %112 = vector.shape_cast %111 : vector<16xf32> to vector<16x1xf32>
    %113 = vector.broadcast %112 : vector<16x1xf32> to vector<16x16xf32>
    %114 = arith.subf %110, %113 : vector<16x16xf32>
    %115 = math.exp %114 : vector<16x16xf32>
    %cst_34 = arith.constant dense<0.000000e+00> : vector<16xf32>
    %116 = vector.multi_reduction <add>, %115, %cst_34 [1] : vector<16x16xf32> to vector<16xf32>
    %117 = vector.shape_cast %116 : vector<16xf32> to vector<16x1xf32>
    %118 = tpu.reciprocal %117 {approx = true} : vector<16x1xf32> -> vector<16x1xf32>
    %119 = vector.broadcast %118 : vector<16x1xf32> to vector<16x16xf32>
    %120 = arith.mulf %115, %119 : vector<16x16xf32>
    %cst_35 = arith.constant dense<0.000000e+00> : vector<16x8xf32>
    %121 = tpu.matmul %120, %105, %cst_35 {dimension_numbers = #tpu.dot_dimension_numbers<[1], [0], [0], [1], [0, 0, 1, 1], [], []>} : vector<16x16xf32>, vector<16x8xf32>, vector<16x8xf32> -> vector<16x8xf32>
    %c0_36 = arith.constant 0 : index
    %c0_37 = arith.constant 0 : index
    %122 = vector.load %arg5[%c0_36, %c0_37] : memref<32x32xf32, #tpu.memory_space<vmem>>, vector<8x32xf32>
    %cst_38 = arith.constant dense<0.000000e+00> : vector<16x32xf32>
    %123 = tpu.matmul %121, %122, %cst_38 {dimension_numbers = #tpu.dot_dimension_numbers<[1], [0], [0], [1], [0, 0, 1, 1], [], []>} : vector<16x8xf32>, vector<8x32xf32>, vector<16x32xf32> -> vector<16x32xf32>
    %124 = arith.addf %102, %123 : vector<16x32xf32>
    %125 = vector.extract_strided_slice %89 {offsets = [0, 8], sizes = [16, 8], strides = [1, 1]} : vector<16x32xf32> to vector<16x8xf32>
    %126 = vector.extract_strided_slice %93 {offsets = [0, 8], sizes = [16, 8], strides = [1, 1]} : vector<16x32xf32> to vector<16x8xf32>
    %127 = vector.extract_strided_slice %97 {offsets = [0, 8], sizes = [16, 8], strides = [1, 1]} : vector<16x32xf32> to vector<16x8xf32>
    %128 = tpu.transpose %126, [1, 0] : vector<16x8xf32> -> vector<8x16xf32>
    %cst_39 = arith.constant dense<0.000000e+00> : vector<16x16xf32>
    %129 = tpu.matmul %125, %128, %cst_39 {dimension_numbers = #tpu.dot_dimension_numbers<[1], [0], [0], [1], [0, 0, 1, 1], [], []>} : vector<16x8xf32>, vector<8x16xf32>, vector<16x16xf32> -> vector<16x16xf32>
    %cst_40 = arith.constant 0.353553385 : f32
    %130 = vector.broadcast %cst_40 : f32 to vector<16x16xf32>
    %131 = arith.mulf %129, %130 : vector<16x16xf32>
    %132 = arith.addf %131, %98 : vector<16x16xf32>
    %cst_41 = arith.constant dense<0xFF800000> : vector<16xf32>
    %133 = vector.multi_reduction <maximumf>, %132, %cst_41 [1] : vector<16x16xf32> to vector<16xf32>
    %134 = vector.shape_cast %133 : vector<16xf32> to vector<16x1xf32>
    %135 = vector.broadcast %134 : vector<16x1xf32> to vector<16x16xf32>
    %136 = arith.subf %132, %135 : vector<16x16xf32>
    %137 = math.exp %136 : vector<16x16xf32>
    %cst_42 = arith.constant dense<0.000000e+00> : vector<16xf32>
    %138 = vector.multi_reduction <add>, %137, %cst_42 [1] : vector<16x16xf32> to vector<16xf32>
    %139 = vector.shape_cast %138 : vector<16xf32> to vector<16x1xf32>
    %140 = tpu.reciprocal %139 {approx = true} : vector<16x1xf32> -> vector<16x1xf32>
    %141 = vector.broadcast %140 : vector<16x1xf32> to vector<16x16xf32>
    %142 = arith.mulf %137, %141 : vector<16x16xf32>
    %cst_43 = arith.constant dense<0.000000e+00> : vector<16x8xf32>
    %143 = tpu.matmul %142, %127, %cst_43 {dimension_numbers = #tpu.dot_dimension_numbers<[1], [0], [0], [1], [0, 0, 1, 1], [], []>} : vector<16x16xf32>, vector<16x8xf32>, vector<16x8xf32> -> vector<16x8xf32>
    %c8 = arith.constant 8 : index
    %c0_44 = arith.constant 0 : index
    %144 = vector.load %arg5[%c8, %c0_44] : memref<32x32xf32, #tpu.memory_space<vmem>>, vector<8x32xf32>
    %cst_45 = arith.constant dense<0.000000e+00> : vector<16x32xf32>
    %145 = tpu.matmul %143, %144, %cst_45 {dimension_numbers = #tpu.dot_dimension_numbers<[1], [0], [0], [1], [0, 0, 1, 1], [], []>} : vector<16x8xf32>, vector<8x32xf32>, vector<16x32xf32> -> vector<16x32xf32>
    %146 = arith.addf %124, %145 : vector<16x32xf32>
    %147 = vector.extract_strided_slice %89 {offsets = [0, 16], sizes = [16, 8], strides = [1, 1]} : vector<16x32xf32> to vector<16x8xf32>
    %148 = vector.extract_strided_slice %93 {offsets = [0, 16], sizes = [16, 8], strides = [1, 1]} : vector<16x32xf32> to vector<16x8xf32>
    %149 = vector.extract_strided_slice %97 {offsets = [0, 16], sizes = [16, 8], strides = [1, 1]} : vector<16x32xf32> to vector<16x8xf32>
    %150 = tpu.transpose %148, [1, 0] : vector<16x8xf32> -> vector<8x16xf32>
    %cst_46 = arith.constant dense<0.000000e+00> : vector<16x16xf32>
    %151 = tpu.matmul %147, %150, %cst_46 {dimension_numbers = #tpu.dot_dimension_numbers<[1], [0], [0], [1], [0, 0, 1, 1], [], []>} : vector<16x8xf32>, vector<8x16xf32>, vector<16x16xf32> -> vector<16x16xf32>
    %cst_47 = arith.constant 0.353553385 : f32
    %152 = vector.broadcast %cst_47 : f32 to vector<16x16xf32>
    %153 = arith.mulf %151, %152 : vector<16x16xf32>
    %154 = arith.addf %153, %98 : vector<16x16xf32>
    %cst_48 = arith.constant dense<0xFF800000> : vector<16xf32>
    %155 = vector.multi_reduction <maximumf>, %154, %cst_48 [1] : vector<16x16xf32> to vector<16xf32>
    %156 = vector.shape_cast %155 : vector<16xf32> to vector<16x1xf32>
    %157 = vector.broadcast %156 : vector<16x1xf32> to vector<16x16xf32>
    %158 = arith.subf %154, %157 : vector<16x16xf32>
    %159 = math.exp %158 : vector<16x16xf32>
    %cst_49 = arith.constant dense<0.000000e+00> : vector<16xf32>
    %160 = vector.multi_reduction <add>, %159, %cst_49 [1] : vector<16x16xf32> to vector<16xf32>
    %161 = vector.shape_cast %160 : vector<16xf32> to vector<16x1xf32>
    %162 = tpu.reciprocal %161 {approx = true} : vector<16x1xf32> -> vector<16x1xf32>
    %163 = vector.broadcast %162 : vector<16x1xf32> to vector<16x16xf32>
    %164 = arith.mulf %159, %163 : vector<16x16xf32>
    %cst_50 = arith.constant dense<0.000000e+00> : vector<16x8xf32>
    %165 = tpu.matmul %164, %149, %cst_50 {dimension_numbers = #tpu.dot_dimension_numbers<[1], [0], [0], [1], [0, 0, 1, 1], [], []>} : vector<16x16xf32>, vector<16x8xf32>, vector<16x8xf32> -> vector<16x8xf32>
    %c16 = arith.constant 16 : index
    %c0_51 = arith.constant 0 : index
    %166 = vector.load %arg5[%c16, %c0_51] : memref<32x32xf32, #tpu.memory_space<vmem>>, vector<8x32xf32>
    %cst_52 = arith.constant dense<0.000000e+00> : vector<16x32xf32>
    %167 = tpu.matmul %165, %166, %cst_52 {dimension_numbers = #tpu.dot_dimension_numbers<[1], [0], [0], [1], [0, 0, 1, 1], [], []>} : vector<16x8xf32>, vector<8x32xf32>, vector<16x32xf32> -> vector<16x32xf32>
    %168 = arith.addf %146, %167 : vector<16x32xf32>
    %169 = vector.extract_strided_slice %89 {offsets = [0, 24], sizes = [16, 8], strides = [1, 1]} : vector<16x32xf32> to vector<16x8xf32>
    %170 = vector.extract_strided_slice %93 {offsets = [0, 24], sizes = [16, 8], strides = [1, 1]} : vector<16x32xf32> to vector<16x8xf32>
    %171 = vector.extract_strided_slice %97 {offsets = [0, 24], sizes = [16, 8], strides = [1, 1]} : vector<16x32xf32> to vector<16x8xf32>
    %172 = tpu.transpose %170, [1, 0] : vector<16x8xf32> -> vector<8x16xf32>
    %cst_53 = arith.constant dense<0.000000e+00> : vector<16x16xf32>
    %173 = tpu.matmul %169, %172, %cst_53 {dimension_numbers = #tpu.dot_dimension_numbers<[1], [0], [0], [1], [0, 0, 1, 1], [], []>} : vector<16x8xf32>, vector<8x16xf32>, vector<16x16xf32> -> vector<16x16xf32>
    %cst_54 = arith.constant 0.353553385 : f32
    %174 = vector.broadcast %cst_54 : f32 to vector<16x16xf32>
    %175 = arith.mulf %173, %174 : vector<16x16xf32>
    %176 = arith.addf %175, %98 : vector<16x16xf32>
    %cst_55 = arith.constant dense<0xFF800000> : vector<16xf32>
    %177 = vector.multi_reduction <maximumf>, %176, %cst_55 [1] : vector<16x16xf32> to vector<16xf32>
    %178 = vector.shape_cast %177 : vector<16xf32> to vector<16x1xf32>
    %179 = vector.broadcast %178 : vector<16x1xf32> to vector<16x16xf32>
    %180 = arith.subf %176, %179 : vector<16x16xf32>
    %181 = math.exp %180 : vector<16x16xf32>
    %cst_56 = arith.constant dense<0.000000e+00> : vector<16xf32>
    %182 = vector.multi_reduction <add>, %181, %cst_56 [1] : vector<16x16xf32> to vector<16xf32>
    %183 = vector.shape_cast %182 : vector<16xf32> to vector<16x1xf32>
    %184 = tpu.reciprocal %183 {approx = true} : vector<16x1xf32> -> vector<16x1xf32>
    %185 = vector.broadcast %184 : vector<16x1xf32> to vector<16x16xf32>
    %186 = arith.mulf %181, %185 : vector<16x16xf32>
    %cst_57 = arith.constant dense<0.000000e+00> : vector<16x8xf32>
    %187 = tpu.matmul %186, %171, %cst_57 {dimension_numbers = #tpu.dot_dimension_numbers<[1], [0], [0], [1], [0, 0, 1, 1], [], []>} : vector<16x16xf32>, vector<16x8xf32>, vector<16x8xf32> -> vector<16x8xf32>
    %c24 = arith.constant 24 : index
    %c0_58 = arith.constant 0 : index
    %188 = vector.load %arg5[%c24, %c0_58] : memref<32x32xf32, #tpu.memory_space<vmem>>, vector<8x32xf32>
    %cst_59 = arith.constant dense<0.000000e+00> : vector<16x32xf32>
    %189 = tpu.matmul %187, %188, %cst_59 {dimension_numbers = #tpu.dot_dimension_numbers<[1], [0], [0], [1], [0, 0, 1, 1], [], []>} : vector<16x8xf32>, vector<8x32xf32>, vector<16x32xf32> -> vector<16x32xf32>
    %190 = arith.addf %168, %189 : vector<16x32xf32>
    %191 = arith.addf %59, %190 : vector<16x32xf32>
    %192 = vector.extract_strided_slice %1 {offsets = [10, 0], sizes = [1, 32], strides = [1, 1]} : vector<22x32xf32> to vector<1x32xf32>
    %193 = vector.extract_strided_slice %1 {offsets = [11, 0], sizes = [1, 32], strides = [1, 1]} : vector<22x32xf32> to vector<1x32xf32>
    %cst_60 = arith.constant dense<0.000000e+00> : vector<16xf32>
    %194 = vector.multi_reduction <add>, %191, %cst_60 [1] : vector<16x32xf32> to vector<16xf32>
    %195 = vector.shape_cast %194 : vector<16xf32> to vector<16x1xf32>
    %cst_61 = arith.constant 3.200000e+01 : f32
    %196 = vector.broadcast %cst_61 : f32 to vector<16x1xf32>
    %197 = arith.divf %195, %196 : vector<16x1xf32>
    %198 = vector.broadcast %197 : vector<16x1xf32> to vector<16x32xf32>
    %199 = arith.subf %191, %198 : vector<16x32xf32>
    %200 = arith.mulf %199, %199 : vector<16x32xf32>
    %cst_62 = arith.constant dense<0.000000e+00> : vector<16xf32>
    %201 = vector.multi_reduction <add>, %200, %cst_62 [1] : vector<16x32xf32> to vector<16xf32>
    %202 = vector.shape_cast %201 : vector<16xf32> to vector<16x1xf32>
    %cst_63 = arith.constant 3.200000e+01 : f32
    %203 = vector.broadcast %cst_63 : f32 to vector<16x1xf32>
    %204 = arith.divf %202, %203 : vector<16x1xf32>
    %205 = vector.broadcast %197 : vector<16x1xf32> to vector<16x32xf32>
    %206 = arith.subf %191, %205 : vector<16x32xf32>
    %cst_64 = arith.constant 9.99999974E-6 : f32
    %207 = vector.broadcast %cst_64 : f32 to vector<16x1xf32>
    %208 = arith.addf %204, %207 : vector<16x1xf32>
    %209 = math.rsqrt %208 : vector<16x1xf32>
    %210 = vector.broadcast %209 : vector<16x1xf32> to vector<16x32xf32>
    %211 = arith.mulf %206, %210 : vector<16x32xf32>
    %212 = vector.broadcast %192 : vector<1x32xf32> to vector<16x32xf32>
    %213 = arith.mulf %211, %212 : vector<16x32xf32>
    %214 = vector.broadcast %193 : vector<1x32xf32> to vector<16x32xf32>
    %215 = arith.addf %213, %214 : vector<16x32xf32>
    %c0_65 = arith.constant 0 : index
    %c0_66 = arith.constant 0 : index
    %216 = vector.load %arg8[%c0_65, %c0_66] : memref<32x64xf32, #tpu.memory_space<vmem>>, vector<32x64xf32>
    %cst_67 = arith.constant dense<0.000000e+00> : vector<16x64xf32>
    %217 = tpu.matmul %215, %216, %cst_67 {dimension_numbers = #tpu.dot_dimension_numbers<[1], [0], [0], [1], [0, 0, 1, 1], [], []>} : vector<16x32xf32>, vector<32x64xf32>, vector<16x64xf32> -> vector<16x64xf32>
    %218 = vector.extract_strided_slice %217 {offsets = [0, 0], sizes = [16, 32], strides = [1, 1]} : vector<16x64xf32> to vector<16x32xf32>
    %219 = vector.extract_strided_slice %1 {offsets = [12, 0], sizes = [1, 32], strides = [1, 1]} : vector<22x32xf32> to vector<1x32xf32>
    %220 = vector.broadcast %219 : vector<1x32xf32> to vector<16x32xf32>
    %221 = arith.addf %218, %220 : vector<16x32xf32>
    %222 = vector.extract_strided_slice %217 {offsets = [0, 32], sizes = [16, 32], strides = [1, 1]} : vector<16x64xf32> to vector<16x32xf32>
    %223 = vector.extract_strided_slice %1 {offsets = [13, 0], sizes = [1, 32], strides = [1, 1]} : vector<22x32xf32> to vector<1x32xf32>
    %224 = vector.broadcast %223 : vector<1x32xf32> to vector<16x32xf32>
    %225 = arith.addf %222, %224 : vector<16x32xf32>
    %226 = arith.negf %225 : vector<16x32xf32>
    %227 = math.exp %226 : vector<16x32xf32>
    %cst_68 = arith.constant 1.000000e+00 : f32
    %228 = vector.broadcast %cst_68 : f32 to vector<16x32xf32>
    %229 = arith.addf %228, %227 : vector<16x32xf32>
    %230 = arith.divf %228, %229 : vector<16x32xf32>
    %231 = arith.mulf %221, %230 : vector<16x32xf32>
    %c0_69 = arith.constant 0 : index
    %c0_70 = arith.constant 0 : index
    %232 = vector.load %arg9[%c0_69, %c0_70] : memref<7x32xf32, #tpu.memory_space<vmem>>, vector<7x32xf32>
    %233 = tpu.iota {dimensions = array<i32: 0>} : vector<16x1xi32>
    %c8_i32 = arith.constant 8 : i32
    %c0_i32 = arith.constant 0 : i32
    %234 = arith.cmpi eq, %c8_i32, %c0_i32 : i32
    %c1_i32 = arith.constant 1 : i32
    %235 = arith.select %234, %c1_i32, %c8_i32 : i32
    %236 = vector.broadcast %235 : i32 to vector<16x1xi32>
    %237 = arith.remsi %233, %236 : vector<16x1xi32>
    %c0_i32_71 = arith.constant 0 : i32
    %238 = vector.broadcast %c0_i32_71 : i32 to vector<16x1xi32>
    %239 = arith.cmpi ne, %237, %238 : vector<16x1xi32>
    %c0_i32_72 = arith.constant 0 : i32
    %240 = vector.broadcast %c0_i32_72 : i32 to vector<16x1xi32>
    %241 = arith.cmpi slt, %237, %240 : vector<16x1xi32>
    %c0_i32_73 = arith.constant 0 : i32
    %242 = arith.cmpi slt, %235, %c0_i32_73 : i32
    %243 = vector.broadcast %242 : i1 to vector<16x1xi1>
    %244 = vector.broadcast %243 : vector<16x1xi1> to vector<16x1xi1>
    %245 = arith.xori %241, %244 : vector<16x1xi1>
    %246 = arith.andi %245, %239 : vector<16x1xi1>
    %247 = vector.broadcast %235 : i32 to vector<16x1xi32>
    %248 = arith.addi %237, %247 : vector<16x1xi32>
    %249 = arith.select %246, %248, %237 : vector<16x1xi1>, vector<16x1xi32>
    %cst_74 = arith.constant 0.000000e+00 : f32
    %250 = vector.broadcast %cst_74 : f32 to vector<16x32xf32>
    %251 = vector.extract_strided_slice %1 {offsets = [14, 0], sizes = [1, 32], strides = [1, 1]} : vector<22x32xf32> to vector<1x32xf32>
    %252 = vector.broadcast %251 : vector<1x32xf32> to vector<16x32xf32>
    %253 = arith.addf %250, %252 : vector<16x32xf32>
    %c3_i32 = arith.constant 3 : i32
    %254 = tpu.dynamic_rotate %231 by %c3_i32 dim 0 : vector<16x32xf32>, i32 -> vector<16x32xf32>
    %c3_i32_75 = arith.constant 3 : i32
    %255 = vector.broadcast %c3_i32_75 : i32 to vector<16x1xi32>
    %256 = arith.cmpi sge, %249, %255 : vector<16x1xi32>
    %cst_76 = arith.constant 0.000000e+00 : f32
    %257 = vector.shape_cast %256 : vector<16x1xi1> to vector<16x1xi1>
    %258 = vector.broadcast %257 : vector<16x1xi1> to vector<16x32xi1>
    %259 = vector.broadcast %cst_76 : f32 to vector<16x32xf32>
    %260 = arith.select %258, %254, %259 : vector<16x32xi1>, vector<16x32xf32>
    %261 = vector.extract_strided_slice %232 {offsets = [0, 0], sizes = [1, 32], strides = [1, 1]} : vector<7x32xf32> to vector<1x32xf32>
    %262 = vector.broadcast %261 : vector<1x32xf32> to vector<16x32xf32>
    %263 = arith.mulf %260, %262 : vector<16x32xf32>
    %264 = arith.addf %253, %263 : vector<16x32xf32>
    %c2_i32 = arith.constant 2 : i32
    %265 = tpu.dynamic_rotate %231 by %c2_i32 dim 0 : vector<16x32xf32>, i32 -> vector<16x32xf32>
    %c2_i32_77 = arith.constant 2 : i32
    %266 = vector.broadcast %c2_i32_77 : i32 to vector<16x1xi32>
    %267 = arith.cmpi sge, %249, %266 : vector<16x1xi32>
    %cst_78 = arith.constant 0.000000e+00 : f32
    %268 = vector.shape_cast %267 : vector<16x1xi1> to vector<16x1xi1>
    %269 = vector.broadcast %268 : vector<16x1xi1> to vector<16x32xi1>
    %270 = vector.broadcast %cst_78 : f32 to vector<16x32xf32>
    %271 = arith.select %269, %265, %270 : vector<16x32xi1>, vector<16x32xf32>
    %272 = vector.extract_strided_slice %232 {offsets = [1, 0], sizes = [1, 32], strides = [1, 1]} : vector<7x32xf32> to vector<1x32xf32>
    %273 = vector.broadcast %272 : vector<1x32xf32> to vector<16x32xf32>
    %274 = arith.mulf %271, %273 : vector<16x32xf32>
    %275 = arith.addf %264, %274 : vector<16x32xf32>
    %c1_i32_79 = arith.constant 1 : i32
    %276 = tpu.dynamic_rotate %231 by %c1_i32_79 dim 0 : vector<16x32xf32>, i32 -> vector<16x32xf32>
    %c1_i32_80 = arith.constant 1 : i32
    %277 = vector.broadcast %c1_i32_80 : i32 to vector<16x1xi32>
    %278 = arith.cmpi sge, %249, %277 : vector<16x1xi32>
    %cst_81 = arith.constant 0.000000e+00 : f32
    %279 = vector.shape_cast %278 : vector<16x1xi1> to vector<16x1xi1>
    %280 = vector.broadcast %279 : vector<16x1xi1> to vector<16x32xi1>
    %281 = vector.broadcast %cst_81 : f32 to vector<16x32xf32>
    %282 = arith.select %280, %276, %281 : vector<16x32xi1>, vector<16x32xf32>
    %283 = vector.extract_strided_slice %232 {offsets = [2, 0], sizes = [1, 32], strides = [1, 1]} : vector<7x32xf32> to vector<1x32xf32>
    %284 = vector.broadcast %283 : vector<1x32xf32> to vector<16x32xf32>
    %285 = arith.mulf %282, %284 : vector<16x32xf32>
    %286 = arith.addf %275, %285 : vector<16x32xf32>
    %287 = vector.extract_strided_slice %232 {offsets = [3, 0], sizes = [1, 32], strides = [1, 1]} : vector<7x32xf32> to vector<1x32xf32>
    %288 = vector.broadcast %287 : vector<1x32xf32> to vector<16x32xf32>
    %289 = arith.mulf %231, %288 : vector<16x32xf32>
    %290 = arith.addf %286, %289 : vector<16x32xf32>
    %c15_i32 = arith.constant 15 : i32
    %291 = tpu.dynamic_rotate %231 by %c15_i32 dim 0 : vector<16x32xf32>, i32 -> vector<16x32xf32>
    %c7_i32 = arith.constant 7 : i32
    %292 = vector.broadcast %c7_i32 : i32 to vector<16x1xi32>
    %293 = arith.cmpi slt, %249, %292 : vector<16x1xi32>
    %cst_82 = arith.constant 0.000000e+00 : f32
    %294 = vector.shape_cast %293 : vector<16x1xi1> to vector<16x1xi1>
    %295 = vector.broadcast %294 : vector<16x1xi1> to vector<16x32xi1>
    %296 = vector.broadcast %cst_82 : f32 to vector<16x32xf32>
    %297 = arith.select %295, %291, %296 : vector<16x32xi1>, vector<16x32xf32>
    %298 = vector.extract_strided_slice %232 {offsets = [4, 0], sizes = [1, 32], strides = [1, 1]} : vector<7x32xf32> to vector<1x32xf32>
    %299 = vector.broadcast %298 : vector<1x32xf32> to vector<16x32xf32>
    %300 = arith.mulf %297, %299 : vector<16x32xf32>
    %301 = arith.addf %290, %300 : vector<16x32xf32>
    %c14_i32 = arith.constant 14 : i32
    %302 = tpu.dynamic_rotate %231 by %c14_i32 dim 0 : vector<16x32xf32>, i32 -> vector<16x32xf32>
    %c6_i32 = arith.constant 6 : i32
    %303 = vector.broadcast %c6_i32 : i32 to vector<16x1xi32>
    %304 = arith.cmpi slt, %249, %303 : vector<16x1xi32>
    %cst_83 = arith.constant 0.000000e+00 : f32
    %305 = vector.shape_cast %304 : vector<16x1xi1> to vector<16x1xi1>
    %306 = vector.broadcast %305 : vector<16x1xi1> to vector<16x32xi1>
    %307 = vector.broadcast %cst_83 : f32 to vector<16x32xf32>
    %308 = arith.select %306, %302, %307 : vector<16x32xi1>, vector<16x32xf32>
    %309 = vector.extract_strided_slice %232 {offsets = [5, 0], sizes = [1, 32], strides = [1, 1]} : vector<7x32xf32> to vector<1x32xf32>
    %310 = vector.broadcast %309 : vector<1x32xf32> to vector<16x32xf32>
    %311 = arith.mulf %308, %310 : vector<16x32xf32>
    %312 = arith.addf %301, %311 : vector<16x32xf32>
    %c13_i32 = arith.constant 13 : i32
    %313 = tpu.dynamic_rotate %231 by %c13_i32 dim 0 : vector<16x32xf32>, i32 -> vector<16x32xf32>
    %c5_i32 = arith.constant 5 : i32
    %314 = vector.broadcast %c5_i32 : i32 to vector<16x1xi32>
    %315 = arith.cmpi slt, %249, %314 : vector<16x1xi32>
    %cst_84 = arith.constant 0.000000e+00 : f32
    %316 = vector.shape_cast %315 : vector<16x1xi1> to vector<16x1xi1>
    %317 = vector.broadcast %316 : vector<16x1xi1> to vector<16x32xi1>
    %318 = vector.broadcast %cst_84 : f32 to vector<16x32xf32>
    %319 = arith.select %317, %313, %318 : vector<16x32xi1>, vector<16x32xf32>
    %320 = vector.extract_strided_slice %232 {offsets = [6, 0], sizes = [1, 32], strides = [1, 1]} : vector<7x32xf32> to vector<1x32xf32>
    %321 = vector.broadcast %320 : vector<1x32xf32> to vector<16x32xf32>
    %322 = arith.mulf %319, %321 : vector<16x32xf32>
    %323 = arith.addf %312, %322 : vector<16x32xf32>
    %324 = vector.extract_strided_slice %1 {offsets = [15, 0], sizes = [1, 32], strides = [1, 1]} : vector<22x32xf32> to vector<1x32xf32>
    %325 = vector.extract_strided_slice %1 {offsets = [16, 0], sizes = [1, 32], strides = [1, 1]} : vector<22x32xf32> to vector<1x32xf32>
    %cst_85 = arith.constant dense<0.000000e+00> : vector<16xf32>
    %326 = vector.multi_reduction <add>, %323, %cst_85 [1] : vector<16x32xf32> to vector<16xf32>
    %327 = vector.shape_cast %326 : vector<16xf32> to vector<16x1xf32>
    %cst_86 = arith.constant 3.200000e+01 : f32
    %328 = vector.broadcast %cst_86 : f32 to vector<16x1xf32>
    %329 = arith.divf %327, %328 : vector<16x1xf32>
    %330 = vector.broadcast %329 : vector<16x1xf32> to vector<16x32xf32>
    %331 = arith.subf %323, %330 : vector<16x32xf32>
    %332 = arith.mulf %331, %331 : vector<16x32xf32>
    %cst_87 = arith.constant dense<0.000000e+00> : vector<16xf32>
    %333 = vector.multi_reduction <add>, %332, %cst_87 [1] : vector<16x32xf32> to vector<16xf32>
    %334 = vector.shape_cast %333 : vector<16xf32> to vector<16x1xf32>
    %cst_88 = arith.constant 3.200000e+01 : f32
    %335 = vector.broadcast %cst_88 : f32 to vector<16x1xf32>
    %336 = arith.divf %334, %335 : vector<16x1xf32>
    %337 = vector.broadcast %329 : vector<16x1xf32> to vector<16x32xf32>
    %338 = arith.subf %323, %337 : vector<16x32xf32>
    %cst_89 = arith.constant 9.99999974E-6 : f32
    %339 = vector.broadcast %cst_89 : f32 to vector<16x1xf32>
    %340 = arith.addf %336, %339 : vector<16x1xf32>
    %341 = math.rsqrt %340 : vector<16x1xf32>
    %342 = vector.broadcast %341 : vector<16x1xf32> to vector<16x32xf32>
    %343 = arith.mulf %338, %342 : vector<16x32xf32>
    %344 = vector.broadcast %324 : vector<1x32xf32> to vector<16x32xf32>
    %345 = arith.mulf %343, %344 : vector<16x32xf32>
    %346 = vector.broadcast %325 : vector<1x32xf32> to vector<16x32xf32>
    %347 = arith.addf %345, %346 : vector<16x32xf32>
    %348 = arith.negf %347 : vector<16x32xf32>
    %349 = math.exp %348 : vector<16x32xf32>
    %cst_90 = arith.constant 1.000000e+00 : f32
    %350 = vector.broadcast %cst_90 : f32 to vector<16x32xf32>
    %351 = arith.addf %350, %349 : vector<16x32xf32>
    %352 = arith.divf %350, %351 : vector<16x32xf32>
    %353 = arith.mulf %347, %352 : vector<16x32xf32>
    %c0_91 = arith.constant 0 : index
    %c0_92 = arith.constant 0 : index
    %354 = vector.load %arg10[%c0_91, %c0_92] : memref<32x32xf32, #tpu.memory_space<vmem>>, vector<32x32xf32>
    %cst_93 = arith.constant dense<0.000000e+00> : vector<16x32xf32>
    %355 = tpu.matmul %353, %354, %cst_93 {dimension_numbers = #tpu.dot_dimension_numbers<[1], [0], [0], [1], [0, 0, 1, 1], [], []>} : vector<16x32xf32>, vector<32x32xf32>, vector<16x32xf32> -> vector<16x32xf32>
    %356 = arith.addf %191, %355 : vector<16x32xf32>
    %357 = vector.extract_strided_slice %1 {offsets = [17, 0], sizes = [1, 32], strides = [1, 1]} : vector<22x32xf32> to vector<1x32xf32>
    %358 = vector.broadcast %357 : vector<1x32xf32> to vector<16x32xf32>
    %359 = arith.addf %356, %358 : vector<16x32xf32>
    %360 = vector.extract_strided_slice %1 {offsets = [18, 0], sizes = [1, 32], strides = [1, 1]} : vector<22x32xf32> to vector<1x32xf32>
    %361 = vector.extract_strided_slice %1 {offsets = [19, 0], sizes = [1, 32], strides = [1, 1]} : vector<22x32xf32> to vector<1x32xf32>
    %cst_94 = arith.constant dense<0.000000e+00> : vector<16xf32>
    %362 = vector.multi_reduction <add>, %359, %cst_94 [1] : vector<16x32xf32> to vector<16xf32>
    %363 = vector.shape_cast %362 : vector<16xf32> to vector<16x1xf32>
    %cst_95 = arith.constant 3.200000e+01 : f32
    %364 = vector.broadcast %cst_95 : f32 to vector<16x1xf32>
    %365 = arith.divf %363, %364 : vector<16x1xf32>
    %366 = vector.broadcast %365 : vector<16x1xf32> to vector<16x32xf32>
    %367 = arith.subf %359, %366 : vector<16x32xf32>
    %368 = arith.mulf %367, %367 : vector<16x32xf32>
    %cst_96 = arith.constant dense<0.000000e+00> : vector<16xf32>
    %369 = vector.multi_reduction <add>, %368, %cst_96 [1] : vector<16x32xf32> to vector<16xf32>
    %370 = vector.shape_cast %369 : vector<16xf32> to vector<16x1xf32>
    %cst_97 = arith.constant 3.200000e+01 : f32
    %371 = vector.broadcast %cst_97 : f32 to vector<16x1xf32>
    %372 = arith.divf %370, %371 : vector<16x1xf32>
    %373 = vector.broadcast %365 : vector<16x1xf32> to vector<16x32xf32>
    %374 = arith.subf %359, %373 : vector<16x32xf32>
    %cst_98 = arith.constant 9.99999974E-6 : f32
    %375 = vector.broadcast %cst_98 : f32 to vector<16x1xf32>
    %376 = arith.addf %372, %375 : vector<16x1xf32>
    %377 = math.rsqrt %376 : vector<16x1xf32>
    %378 = vector.broadcast %377 : vector<16x1xf32> to vector<16x32xf32>
    %379 = arith.mulf %374, %378 : vector<16x32xf32>
    %380 = vector.broadcast %360 : vector<1x32xf32> to vector<16x32xf32>
    %381 = arith.mulf %379, %380 : vector<16x32xf32>
    %382 = vector.broadcast %361 : vector<1x32xf32> to vector<16x32xf32>
    %383 = arith.addf %381, %382 : vector<16x32xf32>
    %384 = vector.extract_strided_slice %1 {offsets = [20, 0], sizes = [1, 32], strides = [1, 1]} : vector<22x32xf32> to vector<1x32xf32>
    %385 = vector.extract_strided_slice %1 {offsets = [21, 0], sizes = [1, 32], strides = [1, 1]} : vector<22x32xf32> to vector<1x32xf32>
    %cst_99 = arith.constant dense<0.000000e+00> : vector<16xf32>
    %386 = vector.multi_reduction <add>, %383, %cst_99 [1] : vector<16x32xf32> to vector<16xf32>
    %387 = vector.shape_cast %386 : vector<16xf32> to vector<16x1xf32>
    %cst_100 = arith.constant 3.200000e+01 : f32
    %388 = vector.broadcast %cst_100 : f32 to vector<16x1xf32>
    %389 = arith.divf %387, %388 : vector<16x1xf32>
    %390 = vector.broadcast %389 : vector<16x1xf32> to vector<16x32xf32>
    %391 = arith.subf %383, %390 : vector<16x32xf32>
    %392 = arith.mulf %391, %391 : vector<16x32xf32>
    %cst_101 = arith.constant dense<0.000000e+00> : vector<16xf32>
    %393 = vector.multi_reduction <add>, %392, %cst_101 [1] : vector<16x32xf32> to vector<16xf32>
    %394 = vector.shape_cast %393 : vector<16xf32> to vector<16x1xf32>
    %cst_102 = arith.constant 3.200000e+01 : f32
    %395 = vector.broadcast %cst_102 : f32 to vector<16x1xf32>
    %396 = arith.divf %394, %395 : vector<16x1xf32>
    %397 = vector.broadcast %389 : vector<16x1xf32> to vector<16x32xf32>
    %398 = arith.subf %383, %397 : vector<16x32xf32>
    %cst_103 = arith.constant 9.99999997E-7 : f32
    %399 = vector.broadcast %cst_103 : f32 to vector<16x1xf32>
    %400 = arith.addf %396, %399 : vector<16x1xf32>
    %401 = math.rsqrt %400 : vector<16x1xf32>
    %402 = vector.broadcast %401 : vector<16x1xf32> to vector<16x32xf32>
    %403 = arith.mulf %398, %402 : vector<16x32xf32>
    %404 = vector.broadcast %384 : vector<1x32xf32> to vector<16x32xf32>
    %405 = arith.mulf %403, %404 : vector<16x32xf32>
    %406 = vector.broadcast %385 : vector<1x32xf32> to vector<16x32xf32>
    %407 = arith.addf %405, %406 : vector<16x32xf32>
    %c0_104 = arith.constant 0 : index
    %c0_105 = arith.constant 0 : index
    %408 = vector.load %arg11[%c0_104, %c0_105] : memref<32x64xf32, #tpu.memory_space<vmem>>, vector<32x64xf32>
    %cst_106 = arith.constant dense<0.000000e+00> : vector<16x64xf32>
    %409 = tpu.matmul %407, %408, %cst_106 {dimension_numbers = #tpu.dot_dimension_numbers<[1], [0], [0], [1], [0, 0, 1, 1], [], []>} : vector<16x32xf32>, vector<32x64xf32>, vector<16x64xf32> -> vector<16x64xf32>
    %cst_107 = arith.constant 0.000000e+00 : f32
    %410 = vector.broadcast %cst_107 : f32 to vector<16x64xf32>
    %411 = arith.maximumf %409, %410 : vector<16x64xf32>
    %c0_108 = arith.constant 0 : index
    %c0_109 = arith.constant 0 : index
    %412 = vector.load %arg12[%c0_108, %c0_109] : memref<64x32xf32, #tpu.memory_space<vmem>>, vector<64x32xf32>
    %cst_110 = arith.constant dense<0.000000e+00> : vector<16x32xf32>
    %413 = tpu.matmul %411, %412, %cst_110 {dimension_numbers = #tpu.dot_dimension_numbers<[1], [0], [0], [1], [0, 0, 1, 1], [], []>} : vector<16x64xf32>, vector<64x32xf32>, vector<16x32xf32> -> vector<16x32xf32>
    %414 = arith.addf %413, %383 : vector<16x32xf32>
    %cst_111 = arith.constant 5.000000e-01 : f32
    %415 = vector.broadcast %cst_111 : f32 to vector<16x32xf32>
    %416 = arith.mulf %415, %414 : vector<16x32xf32>
    %417 = arith.addf %359, %416 : vector<16x32xf32>
    %c0_112 = arith.constant 0 : index
    %c0_113 = arith.constant 0 : index
    %418 = vector.load %arg13[%c0_112, %c0_113] : memref<16x32xf32, #tpu.memory_space<vmem>>, vector<16x32xf32>
    tpu.vector_store %arg13[%c0_112, %c0_113], %417 {strides = array<i32>} : memref<16x32xf32, #tpu.memory_space<vmem>>, vector<16x32xf32>,
    return
  }
  func.func @transform_0(%arg0: i32) -> (i32, i32) {
    %c0_i32 = arith.constant 0 : i32
    %c0_i32_0 = arith.constant 0 : i32
    %c0_i32_1 = arith.constant 0 : i32
    return %c0_i32, %c0_i32_0 : i32, i32
  }
  func.func @transform_1(%arg0: i32) -> (i32, i32) {
    %c0_i32 = arith.constant 0 : i32
    %c0_i32_0 = arith.constant 0 : i32
    %c0_i32_1 = arith.constant 0 : i32
    return %c0_i32, %c0_i32_0 : i32, i32
  }
  func.func @transform_2(%arg0: i32) -> (i32, i32) {
    %c0_i32 = arith.constant 0 : i32
    %c0_i32_0 = arith.constant 0 : i32
    %c0_i32_1 = arith.constant 0 : i32
    return %c0_i32, %c0_i32_0 : i32, i32
  }
  func.func @transform_3(%arg0: i32) -> (i32, i32) {
    %c0_i32 = arith.constant 0 : i32
    %c0_i32_0 = arith.constant 0 : i32
    %c0_i32_1 = arith.constant 0 : i32
    return %c0_i32, %c0_i32_0 : i32, i32
  }
  func.func @transform_4(%arg0: i32) -> (i32, i32) {
    %c0_i32 = arith.constant 0 : i32
    %c0_i32_0 = arith.constant 0 : i32
    %c0_i32_1 = arith.constant 0 : i32
    return %c0_i32, %c0_i32_0 : i32, i32
  }
  func.func @transform_5(%arg0: i32) -> (i32, i32) {
    %c0_i32 = arith.constant 0 : i32
    %c0_i32_0 = arith.constant 0 : i32
    %c0_i32_1 = arith.constant 0 : i32
    return %c0_i32, %c0_i32_0 : i32, i32
  }
  func.func @transform_6(%arg0: i32) -> (i32, i32) {
    %c0_i32 = arith.constant 0 : i32
    %c0_i32_0 = arith.constant 0 : i32
    %c0_i32_1 = arith.constant 0 : i32
    return %c0_i32, %c0_i32_0 : i32, i32
  }
  func.func @transform_7(%arg0: i32) -> (i32, i32) {
    %c0_i32 = arith.constant 0 : i32
    %c0_i32_0 = arith.constant 0 : i32
    %c0_i32_1 = arith.constant 0 : i32
    return %c0_i32, %c0_i32_0 : i32, i32
  }
  func.func @transform_8(%arg0: i32) -> (i32, i32) {
    %c0_i32 = arith.constant 0 : i32
    %c0_i32_0 = arith.constant 0 : i32
    %c0_i32_1 = arith.constant 0 : i32
    return %c0_i32, %c0_i32_0 : i32, i32
  }
  func.func @transform_9(%arg0: i32) -> (i32, i32) {
    %c0_i32 = arith.constant 0 : i32
    %c0_i32_0 = arith.constant 0 : i32
    %c0_i32_1 = arith.constant 0 : i32
    return %c0_i32, %c0_i32_0 : i32, i32
  }
  func.func @transform_10(%arg0: i32) -> (i32, i32) {
    %c0_i32 = arith.constant 0 : i32
    %c0_i32_0 = arith.constant 0 : i32
    %c0_i32_1 = arith.constant 0 : i32
    return %c0_i32, %c0_i32_0 : i32, i32
  }
  func.func @transform_11(%arg0: i32) -> (i32, i32) {
    %c0_i32 = arith.constant 0 : i32
    %c0_i32_0 = arith.constant 0 : i32
    %c0_i32_1 = arith.constant 0 : i32
    return %c0_i32, %c0_i32_0 : i32, i32
  }
  func.func @transform_12(%arg0: i32) -> (i32, i32) {
    %c0_i32 = arith.constant 0 : i32
    %c0_i32_0 = arith.constant 0 : i32
    %c0_i32_1 = arith.constant 0 : i32
    return %c0_i32, %c0_i32_0 : i32, i32
  }
}

</mosaic_0001>

<bundles_post_ra>
// kernel: tpu_custom_call.1
= control target key start
LH: loop header
LB: loop body
LE: loop exit
PB: predicated region body
PF: predicated region fallthrough
CT: control target
= control target key end

     0   :  { %17 = vsyncpa [#allocation3], 0  ;;  %s3537_s0 = inlined_call_operand.hbm [shape: f32[16,32], index: 0, kind: input, shape index: {}]   ;;  %s3538_s1 = inlined_call_operand.hbm [shape: f32[16,16], index: 1, kind: input, shape index: {}]   ;;  %s3539_s2 = inlined_call_operand.hbm [shape: f32[22,32], index: 2, kind: input, shape index: {}]   ;;  %s3540_s3 = inlined_call_operand.vmem [shape: f32[32,96], index: 3, kind: input, shape index: {}]   ;;  %s3541_s4 = inlined_call_operand.vmem [shape: f32[32,32], index: 4, kind: input, shape index: {}]   ;;  %s3542_s5 = inlined_call_operand.vmem [shape: f32[32,64], index: 5, kind: input, shape index: {}]   ;;  %s3543_s6 = inlined_call_operand.vmem [shape: f32[64,32], index: 6, kind: input, shape index: {}]   ;;  %s3544_s7 = inlined_call_operand.vmem [shape: f32[32,64], index: 7, kind: input, shape index: {}]   ;;  %s3545_s8 = inlined_call_operand.vmem [shape: f32[7,32], index: 8, kind: input, shape index: {}]   ;;  %s3546_s9 = inlined_call_operand.vmem [shape: f32[32,32], index: 9, kind: input, shape index: {}]   ;;  %s3547_s10 = inlined_call_operand.vmem [shape: f32[32,64], index: 10, kind: input, shape index: {}]   ;;  %s3548_s11 = inlined_call_operand.vmem [shape: f32[64,32], index: 11, kind: input, shape index: {}]   ;;  %s3549_s12 = inlined_call_operand.hbm [shape: f32[16,32], index: 12, kind: output, shape index: {}]  }
   0x1   :  { %18 = vsyncpa [#allocation6], 0 }
   0x2   :  { %19 = vsyncpa [#allocation4], 0  ;;  %s2903_s21 = smov [#allocation5]   ;;  %s2904_s23 = smov [#allocation2]  }
   0x3   :  { %s37_s22 = sshll.u32 %s2903_s21, 4  ;;  %s25_s24 = sshll.u32 %s2904_s23, 4  ;;  %s38_s22 = int_to_ptr.vmem [resolvable:$true] %s37_s22  ;;  %s26_s24 = int_to_ptr.vmem [resolvable:$true] %s25_s24 }
   0x4   :  { %s2825_s25 = scalar_lea.vmem %s38_s22, 256  ;;  %p2830_p1 = scmp.lt.s32.totalorder %s38_s22, %s38_s22 }
   0x5   :  { %p2826_p0 = scmp.ne.s32.totalorder %s38_s22, %s2825_s25  ;;  %p2831_p2 = scmp.lt.s32.totalorder %s2825_s25, %s2825_s25 }
   0x7   :  { %p2832_p3 = por %p2831_p2, %p2830_p1 }
   0x9   :  { %p2833_p4 = pnand %p2832_p3, %p2826_p0 }
   0xb   :  { %2836 = shalt.err (!%p2833_p4)
}
   0xc   :  { %s2905_s26 = smov 128   ;;  %s2906_s27 = smov 8  }
   0xd   :  { %43 = dma.hbm_to_vmem [thread:$0]  %s3538_s1, 256, %s38_s22, [#allocation6], %s2905_s26, %s2905_s26, %s2906_s27  }
   0xe   :  { %s2845_s30 = scalar_lea.vmem %s26_s24, 256  ;;  %p2850_p6 = scmp.lt.s32.totalorder %s26_s24, %s26_s24 }
   0xf   :  { %p2846_p5 = scmp.ne.s32.totalorder %s26_s24, %s2845_s30  ;;  %p2851_p7 = scmp.lt.s32.totalorder %s2845_s30, %s2845_s30 }
  0x11   :  { %p2852_p8 = por %p2851_p7, %p2850_p6 }
  0x13   :  { %p2853_p9 = pnand %p2852_p8, %p2846_p5 }
  0x15   :  { %2856 = shalt.err (!%p2853_p9)
}
  0x16   :  { %31 = dma.hbm_to_vmem [thread:$0]  %s3537_s0, 256, %s26_s24, [#allocation3], %s2905_s26, %s2905_s26, %s2906_s27  }
  0x17   :  { %s2907_s15 = smov [#allocation7]  }
  0x18   :  { %s49_s16 = sshll.u32 %s2907_s15, 4  ;;  %s50_s16 = int_to_ptr.vmem [resolvable:$true] %s49_s16 }
  0x19   :  { %s2865_s17 = scalar_lea.vmem %s50_s16, 384  ;;  %p2870_p11 = scmp.lt.s32.totalorder %s50_s16, %s50_s16 }
  0x1a   :  { %p2866_p10 = scmp.ne.s32.totalorder %s50_s16, %s2865_s17  ;;  %p2871_p12 = scmp.lt.s32.totalorder %s2865_s17, %s2865_s17 }
  0x1c   :  { %p2872_p13 = por %p2871_p12, %p2870_p11 }
  0x1e   :  { %p2873_p0 = pnand %p2872_p13, %p2866_p10 }
  0x20   :  { %2876 = shalt.err (!%p2873_p0)
}
  0x21   :  { %55 = dma.hbm_to_vmem [thread:$0]  %s3539_s2, 384, %s50_s16, [#allocation6], %s2905_s26, %s2905_s26, %s2906_s27  }
  0x22   :  { %2897 = dma.done.wait [#allocation3], 256  }
  0x23   :  { %2898 = vsyncadd [#allocation3], 4294967040 }
  0x24   :  { %2899 = dma.done.wait [#allocation6], 640  }
  0x25   :  { %2900 = vsyncadd [#allocation6], 4294966656  ;;  %vm3551_vm0 = vcmask 261120   ;;  %v3004_v0 = vld [vmem:[#allocation2] sm:$0xff]  ;;  %v3006_v1 = vld [vmem:[#allocation2 + $0x8] sm:$0xff]  ;;  %v116_v19 = vlaneseq  ;;  %vm3550_vm1 = vcmask 523264  }
  0x26   :  { %v89_v2 = vsel %vm3551_vm0, %v3004_v0, 0.0  ;;  %v92_v3 = vsel %vm3551_vm0, %v3006_v1, 0.0  ;;  %v3021_v23 = vld [vmem:[#allocation7] sm:$0xff]  ;;  %v169_v47 = vld [vmem:[%s3542_s5 + $0x18] sm:$0xff]  ;;  %v168_v48 = vld [vmem:[%s3542_s5 + $0x10] sm:$0xff]  ;;  %s2908_s30 = smov 32  }
  0x27   :  { %90 = vadd.xlane.f32.xlu0 %v89_v2  ;;  %v3016_v21 = vshrl.u32 %v116_v19, 7  ;;  %2554 = vmatprep.subr.mxu0 %v169_v47  ;;  %v167_v49 = vld [vmem:[%s3542_s5 + $0x8] sm:$0xff]  ;;  %v166_v50 = vld [vmem:[%s3542_s5] sm:$0xff]  ;;  %v260_v51 = vld [vmem:[%s3543_s6 + $0x38] sm:$0xff]  ;;  %vm509_vm2 = vcmask 64512   ;;  %vm599_vm3 = vcmask 130048  }
  0x28   :  { %2555 = vmatpush3.msra.mxu0 %v169_v47  ;;  %v259_v52 = vld [vmem:[%s3543_s6 + $0x30] sm:$0xff]  ;;  %2565 = vmatprep.subr.mxu1 %v260_v51  ;;  %v258_v53 = vld [vmem:[%s3543_s6 + $0x28] sm:$0xff]  ;;  %v257_v54 = vld [vmem:[%s3543_s6 + $0x20] sm:$0xff]  ;;  %s2910_s13 = smov 64   ;;  %s2911_s14 = smov 88  }
  0x29   :  { %v3019_v22 = vsub.s32 2, %v3016_v21  ;;  %v3024_v24 = vsub.s32 3, %v3016_v21  ;;  %2556 = vmatprep.subr.mxu0 %v168_v48  ;;  %2566 = vmatpush3.msra.mxu1 %v260_v51  ;;  %v256_v55 = vld [vmem:[%s3543_s6 + $0x18] sm:$0xff]  ;;  %v3070_v62 = vsub.s32 0, %v3016_v21  ;;  %v3073_v63 = vsub.s32 1, %v3016_v21  ;;  %s2912_s15 = smov 120  }
  0x2a   :  { %2557 = vmatpush3.msra.mxu0 %v168_v48  ;;  %2567 = vmatprep.subr.mxu1 %v259_v52  ;;  %s2913_s5 = smov 80   ;;  %s2914_s16 = smov 112   ;;  %vm1857_vm4 = vcmp.lt.s32.totalorder %v3016_v21, 3  ;;  %vm1878_vm6 = vcmp.lt.s32.totalorder %v3016_v21, 2  ;;  %vm1899_vm7 = vcmp.lt.s32.totalorder %v3016_v21, 1  ;;  %vm1928_vm8 = vcmp.lt.s32.totalorder %v3016_v21, 7 }
  0x2b   :  { %93 = vadd.xlane.f32.xlu0 %v92_v3  ;;  %v119_v25 = vrot.slane %v3021_v23, %v3019_v22  ;;  %v125_v28 = vrot.slane %v3021_v23, %v3024_v24  ;;  %2558 = vmatprep.subr.mxu0 %v167_v49  ;;  %v157_v2 = vrot.slane %v3021_v23, %v3070_v62  ;;  %s2915_s18 = smov 56   ;;  %s2916_s0 = smov 72   ;;  %vm1949_vm12 = vcmp.lt.s32.totalorder %v3016_v21, 6 }
  0x2c   :  { %2559 = vmatpush3.msra.mxu0 %v167_v49  ;;  %2568 = vmatpush3.msra.mxu1 %v259_v52  ;;  %s2917_s2 = smov 104   ;;  %s2918_s19 = smov 48   ;;  %vm1970_vm14 = vcmp.lt.s32.totalorder %v3016_v21, 5 }
  0x2d   :  { %2560 = vmatprep.subr.mxu0 %v166_v50  ;;  %2569 = vmatprep.subr.mxu1 %v258_v53  ;;  %s2919_s23 = smov 40  }
  0x2e   :  { %2561 = vmatpush3.msra.mxu0 %v166_v50  ;;  %2570 = vmatpush3.msra.mxu1 %v258_v53  ;;  %v3126_v53 = vsub.s32 4, %v3016_v21 }
  0x2f   :  { %2571 = vmatprep.subr.mxu1 %v257_v54 }
  0x30   :  { %2572 = vmatpush3.msra.mxu1 %v257_v54 }
  0x31   :  { %2573 = vmatprep.subr.mxu1 %v256_v55 }
  0x32   :  { %2574 = vmatpush3.msra.mxu1 %v256_v55  ;;  %v376_v55 = vrot.slane %v3021_v23, %v3126_v53 }
  0xb0   :  { %v91_v4 = vpop.xlane.xlu0 %90 }
  0xb1   :  { %v96_v5 = vmul.f32 0.03125, %v91_v4 }
  0xb3   :  { %v98_v6 = vsub.f32 %v3004_v0, %v96_v5  ;;  %v163_v5 = vrot.slane %v3021_v23, %v3073_v63 }
  0xb4   :  { %v94_v7 = vpop.xlane.xlu0 %93 }
  0xb5   :  { %v97_v8 = vmul.f32 0.03125, %v94_v7  ;;  %v100_v9 = vmul.f32 %v98_v6, %v98_v6 }
  0xb7   :  { %v99_v10 = vsub.f32 %v3006_v1, %v97_v8  ;;  %v102_v11 = vsel %vm3551_vm0, %v100_v9, 0.0 }
  0xb8   :  { %103 = vadd.xlane.f32.xlu1 %v102_v11 }
  0xb9   :  { %v101_v12 = vmul.f32 %v99_v10, %v99_v10 }
  0xbb   :  { %v105_v13 = vsel %vm3551_vm0, %v101_v12, 0.0  ;;  %v255_v12 = vld [vmem:[%s3543_s6 + $0x10] sm:$0xff] }
  0xbc   :  { %106 = vadd.xlane.f32.xlu1 %v105_v13  ;;  %2575 = vmatprep.subr.mxu1 %v255_v12  ;;  %v254_v13 = vld [vmem:[%s3543_s6 + $0x8] sm:$0xff] }
  0xbd   :  { %2576 = vmatpush3.msra.mxu1 %v255_v12 }
  0xbe   :  { %2577 = vmatprep.subr.mxu1 %v254_v13 }
  0xbf   :  { %2578 = vmatpush3.msra.mxu1 %v254_v13 }
 0x141   :  { %v104_v14 = vpop.xlane.xlu1 %103 }
 0x142   :  { %v108_v15 = vmul.f32 0.03125, %v104_v14  ;;  %v253_v14 = vld [vmem:[%s3543_s6] sm:$0xff] }
 0x143   :  { %2579 = vmatprep.subr.mxu1 %v253_v14 }
 0x144   :  { %v110_v16 = vadd.f32 1e-05, %v108_v15  ;;  %2580 = vmatpush3.msra.mxu1 %v253_v14 }
 0x145   :  { %v107_v17 = vpop.xlane.xlu1 %106 }
 0x146   :  { %2741 = vrsqrt.f32 %v110_v16  ;;  %v109_v18 = vmul.f32 0.03125, %v107_v17 }
 0x148   :  { %v111_v20 = vadd.f32 1e-05, %v109_v18 }
 0x14a   :  { %2743 = vrsqrt.f32 %v111_v20 }
 0x153   :  { %v2742_v26 = vpop.eup %2741 }
 0x154   :  { %v114_v27 = vmul.f32 %v2742_v26, %v98_v6 }
 0x156   :  { %v120_v29 = vmul.f32 %v119_v25, %v114_v27 }
 0x157   :  { %v2744_v30 = vpop.eup %2743 }
 0x158   :  { %v3030_v31 = vadd.f32 %v125_v28, %v120_v29  ;;  %v115_v32 = vmul.f32 %v2744_v30, %v99_v10 }
 0x15a   :  { %v128_v33 = vsel %vm3551_vm0, %v3030_v31, 0.0  ;;  %v121_v34 = vmul.f32 %v119_v25, %v115_v32 }
 0x15b   :  { %129 = vadd.xlane.f32.xlu0 %v128_v33 }
 0x15c   :  { %v3034_v35 = vadd.f32 %v125_v28, %v121_v34 }
 0x15e   :  { %v131_v36 = vsel %vm3551_vm0, %v3034_v35, 0.0 }
 0x15f   :  { %132 = vadd.xlane.f32.xlu1 %v131_v36 }
 0x1e4   :  { %v130_v37 = vpop.xlane.xlu0 %129 }
 0x1e5   :  { %v134_v38 = vmul.f32 0.03125, %v130_v37 }
 0x1e7   :  { %v136_v39 = vsub.f32 %v3030_v31, %v134_v38 }
 0x1e8   :  { %v133_v40 = vpop.xlane.xlu1 %132 }
 0x1e9   :  { %v135_v41 = vmul.f32 0.03125, %v133_v40  ;;  %v138_v42 = vmul.f32 %v136_v39, %v136_v39 }
 0x1eb   :  { %v137_v43 = vsub.f32 %v3034_v35, %v135_v41  ;;  %v140_v44 = vsel %vm3551_vm0, %v138_v42, 0.0  ;;  %v388_v41 = vld [vmem:[%s3540_s3 + $0x18] sm:$0xff]  ;;  %v387_v42 = vld [vmem:[%s3540_s3 + $0x10] sm:$0xff] }
 0x1ec   :  { %141 = vadd.xlane.f32.xlu0 %v140_v44  ;;  %2584 = vmatprep.subr.mxu0 %v388_v41  ;;  %v385_v44 = vld [vmem:[%s3540_s3] sm:$0xff] }
 0x1ed   :  { %v139_v45 = vmul.f32 %v137_v43, %v137_v43 }
 0x1ef   :  { %v143_v46 = vsel %vm3551_vm0, %v139_v45, 0.0  ;;  %v478_v45 = vsub.s32 7, %v3016_v21 }
 0x1f0   :  { %144 = vadd.xlane.f32.xlu1 %v143_v46 }
 0x1f1   :  { %v479_v46 = vrot.slane %v3021_v23, %v478_v45 }
 0x275   :  { %v142_v56 = vpop.xlane.xlu0 %141 }
 0x276   :  { %v146_v57 = vmul.f32 0.03125, %v142_v56  ;;  %v3131_v56 = vsub.s32 5, %v3016_v21 }
 0x278   :  { %v148_v58 = vadd.f32 1e-06, %v146_v57 }
 0x279   :  { %v145_v59 = vpop.xlane.xlu1 %144 }
 0x27a   :  { %2745 = vrsqrt.f32 %v148_v58  ;;  %v147_v60 = vmul.f32 0.03125, %v145_v59 }
 0x27c   :  { %v149_v61 = vadd.f32 1e-06, %v147_v60 }
 0x27e   :  { %2747 = vrsqrt.f32 %v149_v61  ;;  %v382_v61 = vrot.slane %v3021_v23, %v3131_v56 }
 0x287   :  { %v2746_v3 = vpop.eup %2745 }
 0x288   :  { %v152_v4 = vmul.f32 %v2746_v3, %v136_v39 }
 0x28a   :  { %v158_v6 = vmul.f32 %v157_v2, %v152_v4 }
 0x28b   :  { %v2748_v7 = vpop.eup %2747 }
 0x28c   :  { %v153_v8 = vmul.f32 %v2748_v7, %v137_v43  ;;  %v164_v9 = vadd.f32 %v163_v5, %v158_v6  ;;  %v386_v43 = vld [vmem:[%s3540_s3 + $0x8] sm:$0xff]  ;;  %s2909_s3 = smov 96  }
 0x28e   :  { %v159_v10 = vmul.f32 %v157_v2, %v153_v8  ;;  %2562 = vmatprep.mubr.msk.f32.mxu0 %vm3551_vm0, %v164_v9 }
 0x290   :  { %v165_v11 = vadd.f32 %v163_v5, %v159_v10  ;;  %v3138_v5 = vsub.s32 6, %v3016_v21 }
 0x292   :  { %2563 = vmatmul.mubr.msk.f32.vlgmr.msra.gmra.mxu0 %vm3551_vm0, %v165_v11  ;;  %v473_v8 = vrot.slane %v3021_v23, %v3138_v5 }
 0x293   :  { %2585 = vmatpush3.msra.mxu0 %v388_v41 }
 0x294   :  { %2586 = vmatprep.subr.mxu0 %v387_v42 }
 0x295   :  { %2587 = vmatpush3.msra.mxu0 %v387_v42 }
 0x296   :  { %2588 = vmatprep.subr.mxu0 %v386_v43 }
 0x297   :  { %2589 = vmatpush3.msra.mxu0 %v386_v43 }
 0x298   :  { %2590 = vmatprep.subr.mxu0 %v385_v44 }
 0x299   :  { %2591 = vmatpush3.msra.mxu0 %v385_v44 }
 0x352   :  { %v2564_v15 = vpop.f32.mrf.mxu0 }
 0x353   :  { %v252_v18 = vmax.f32 %v2564_v15, 0.0 }
 0x354   :  { %v242_v16 = vpop.f32.mrf.mxu0 }
 0x355   :  { %v251_v17 = vmax.f32 %v242_v16, 0.0  ;;  %v3162_v16 = vld [vmem:[#allocation5 + $0x8] sm:$0xff] }
 0x357   :  { %2581 = vmatprep.mubr.msk.f32.mxu1 %vm3550_vm1, %v251_v17 }
 0x358   :  { %2582 = vmatmul.mubr.msk.f32.vlgmr.msra.gmra.mxu1 %vm3550_vm1, %v252_v18 }
 0x418   :  { %v2583_v19 = vpop.f32.mrf.mxu1 }
 0x419   :  { %v340_v20 = vadd.f32 %v2583_v19, %v3034_v35  ;;  %v3164_v19 = vld [vmem:[#allocation5] sm:$0xff] }
 0x41a   :  { %v334_v25 = vpop.f32.mrf.mxu1 }
 0x41b   :  { %v344_v26 = vmul.f32 0.5, %v340_v20  ;;  %v335_v27 = vadd.f32 %v334_v25, %v3030_v31 }
 0x41d   :  { %v3095_v28 = vadd.f32 %v344_v26, %v3006_v1  ;;  %v343_v29 = vmul.f32 0.5, %v335_v27 }
 0x41f   :  { %v3098_v30 = vadd.f32 %v343_v29, %v3004_v0  ;;  %v350_v32 = vsel %vm3551_vm0, %v3095_v28, 0.0 }
 0x420   :  { %351 = vadd.xlane.f32.xlu1 %v350_v32  ;;  %v3170_v32 = vld [vmem:[#allocation7 + $0x8] sm:$0xff] }
 0x421   :  { %v347_v33 = vsel %vm3551_vm0, %v3098_v30, 0.0 }
 0x422   :  { %348 = vadd.xlane.f32.xlu0 %v347_v33  ;;  %v489_v33 = vrot.slane %v3170_v32, %v3070_v62 }
 0x4a9   :  { %v352_v34 = vpop.xlane.xlu1 %351 }
 0x4aa   :  { %v354_v35 = vmul.f32 0.03125, %v352_v34 }
 0x4ab   :  { %v349_v36 = vpop.xlane.xlu0 %348 }
 0x4ac   :  { %v356_v31 = vsub.f32 %v3095_v28, %v354_v35  ;;  %v353_v37 = vmul.f32 0.03125, %v349_v36 }
 0x4ae   :  { %v355_v1 = vsub.f32 %v3098_v30, %v353_v37  ;;  %v358_v38 = vmul.f32 %v356_v31, %v356_v31 }
 0x4b0   :  { %v362_v0 = vsel %vm3551_vm0, %v358_v38, 0.0  ;;  %v357_v39 = vmul.f32 %v355_v1, %v355_v1 }
 0x4b1   :  { %363 = vadd.xlane.f32.xlu1 %v362_v0 }
 0x4b2   :  { %v359_v40 = vsel %vm3551_vm0, %v357_v39, 0.0 }
 0x4b3   :  { %360 = vadd.xlane.f32.xlu0 %v359_v40 }
 0x4c9   :  { %481 = vrot.lane.b32.xlu0 %v479_v46, %s2908_s30 }
 0x53a   :  { %v364_v47 = vpop.xlane.xlu1 %363 }
 0x53b   :  { %v366_v48 = vmul.f32 0.03125, %v364_v47 }
 0x53c   :  { %v361_v49 = vpop.xlane.xlu0 %360 }
 0x53d   :  { %v368_v50 = vadd.f32 1e-05, %v366_v48  ;;  %v365_v51 = vmul.f32 0.03125, %v361_v49 }
 0x53f   :  { %2749 = vrsqrt.f32 %v368_v50  ;;  %v367_v52 = vadd.f32 1e-05, %v365_v51 }
 0x540   :  { %v482_v6 = vpop.permute.xlu0 %481 }
 0x541   :  { %2751 = vrsqrt.f32 %v367_v52 }
 0x54c   :  { %v2750_v54 = vpop.eup %2749 }
 0x54d   :  { %v372_v57 = vmul.f32 %v2750_v54, %v356_v31 }
 0x54e   :  { %v2752_v58 = vpop.eup %2751 }
 0x54f   :  { %v371_v59 = vmul.f32 %v2752_v58, %v355_v1  ;;  %v378_v60 = vmul.f32 %v376_v55, %v372_v57 }
 0x551   :  { %v377_v2 = vmul.f32 %v376_v55, %v371_v59  ;;  %v384_v4 = vadd.f32 %v382_v61, %v378_v60 }
 0x553   :  { %v383_v3 = vadd.f32 %v382_v61, %v377_v2 }
 0x555   :  { %2592 = vmatprep.mubr.msk.f32.mxu0 %vm3551_vm0, %v383_v3  ;;  %v711_v3 = vld [vmem:[%s3541_s4] sm:$0xff] }
 0x556   :  { %2593 = vmatmul.mubr.msk.f32.vlgmr.msra.gmra.mxu0 %vm3551_vm0, %v384_v4  ;;  %2609 = vmatprep.subr.mxu1 %v711_v3 }
 0x557   :  { %2610 = vmatpush3.msra.mxu1 %v711_v3 }
 0x616   :  { %v2594_v7 = vpop.f32.mrf.mxu0 }
 0x617   :  { %v3142_v9 = vadd.f32 %v2594_v7, %v482_v6  ;;  %v3158_v14 = vadd.f32 %v2594_v7, %v473_v8 }
 0x618   :  { %v461_v10 = vpop.f32.mrf.mxu0 }
 0x619   :  { %v3144_v11 = vadd.f32 %v473_v8, %v461_v10  ;;  %507 = vrot.lane.b32.xlu1 %v3142_v9, %s2909_s3  ;;  %v3148_v12 = vadd.f32 %v482_v6, %v461_v10 }
 0x61b   :  { %2599 = vmatprep.mubr.msk.f32.mxu0 %vm509_vm2, %v3144_v11 }
 0x61d   :  { %505 = vrot.lane.b32.xlu1 %v3148_v12, %s2909_s3 }
 0x68b   :  { %v508_v13 = vpop.permute.xlu1 %507 }
 0x68c   :  { %2595 = vmatprep.subr.msk.mxu0 %vm509_vm2, %v508_v13 }
 0x68d   :  { %2596 = vmatpush3.xpose.msk.msra.mxu0 %vm509_vm2, %v508_v13 }
 0x68f   :  { %v506_v23 = vpop.permute.xlu1 %505 }
 0x690   :  { %2597 = vmatprep.subr.msk.mxu0 %vm509_vm2, %v506_v23 }
 0x691   :  { %2598 = vmatpush3.xpose.msk.msra.mxu0 %vm509_vm2, %v506_v23 }
 0x694   :  { %2600 = vmatmul.mubr.msk.f32.vlgmr.msra.gmra.mxu0 %vm509_vm2, %v3158_v14 }
 0x754   :  { %v2601_v15 = vpop.f32.mrf.mxu0 }
 0x755   :  { %v596_v17 = vmul.f32 0.35355338, %v2601_v15 }
 0x756   :  { %v586_v18 = vpop.f32.mrf.mxu0 }
 0x757   :  { %v595_v20 = vmul.f32 0.35355338, %v586_v18  ;;  %v598_v25 = vadd.f32 %v596_v17, %v3162_v16 }
 0x759   :  { %v603_v26 = vsel %vm599_vm3, %v598_v25, -inf  ;;  %v597_v27 = vadd.f32 %v595_v20, %v3164_v19 }
 0x75a   :  { %604 = vmax.xlane.f32.xlu0 %v603_v26 }
 0x75b   :  { %v600_v29 = vsel %vm599_vm3, %v597_v27, -inf }
 0x75c   :  { %601 = vmax.xlane.f32.xlu1 %v600_v29 }
 0x770   :  { %491 = vrot.lane.b32.xlu0 %v489_v33, %s2910_s13 }
 0x7e3   :  { %v605_v34 = vpop.xlane.xlu0 %604 }
 0x7e4   :  { %v607_v37 = vsub.f32 %v598_v25, %v605_v34 }
 0x7e5   :  { %v602_v1 = vpop.xlane.xlu1 %601 }
 0x7e6   :  { %v610_v38 = vmul.f32 1.442695, %v607_v37  ;;  %v606_v0 = vsub.f32 %v597_v27, %v602_v1 }
 0x7e7   :  { %v492_v35 = vpop.permute.xlu0 %491 }
 0x7e8   :  { %v3174_v36 = vadd.f32 %v492_v35, %v461_v10  ;;  %v3176_v31 = vadd.f32 %v2594_v7, %v492_v35  ;;  %2753 = vpow2.f32 %v610_v38  ;;  %v608_v39 = vmul.f32 1.442695, %v606_v0 }
 0x7ea   :  { %624 = vrot.lane.b32.xlu0 %v3174_v36, %s2910_s13  ;;  %626 = vrot.lane.b32.xlu1 %v3176_v31, %s2910_s13  ;;  %2755 = vpow2.f32 %v608_v39 }
 0x7ee   :  { %801 = vrot.lane.b32.xlu0 %v3142_v9, %s2911_s14  ;;  %799 = vrot.lane.b32.xlu1 %v3148_v12, %s2911_s14 }
 0x7f2   :  { %795 = vrot.lane.b32.xlu0 %v3144_v11, %s2912_s15 }
 0x7f5   :  { %v2754_v40 = vpop.eup %2753 }
 0x7f6   :  { %1089 = vrot.lane.b32.xlu0 %v3142_v9, %s2913_s5  ;;  %v615_v41 = vsel %vm599_vm3, %v2754_v40, 0.0 }
 0x7f7   :  { %v2756_v42 = vpop.eup %2755 }
 0x7f8   :  { %v612_v43 = vsel %vm599_vm3, %v2756_v42, 0.0 }
 0x7fa   :  { %1083 = vrot.lane.b32.xlu0 %v3144_v11, %s2914_s16 }
 0x812   :  { %616 = vadd.xlane.f32.xlu1 %v615_v41 }
 0x816   :  { %613 = vadd.xlane.f32.xlu1 %v612_v43 }
 0x827   :  { %797 = vrot.lane.b32.xlu1 %v3158_v14, %s2912_s15 }
 0x82b   :  { %1087 = vrot.lane.b32.xlu1 %v3148_v12, %s2913_s5 }
 0x82f   :  { %1085 = vrot.lane.b32.xlu1 %v3158_v14, %s2914_s16 }
 0x85c   :  { %v625_v44 = vpop.permute.xlu0 %624  ;;  %v627_v46 = vpop.permute.xlu1 %626 }
 0x85d   :  { %2602 = vmatprep.subr.mxu0 %v627_v46 }
 0x85e   :  { %2603 = vmatpush3.msra.mxu0 %v627_v46 }
 0x85f   :  { %2604 = vmatprep.subr.mxu0 %v625_v44 }
 0x860   :  { %v802_v47 = vpop.permute.xlu0 %801  ;;  %2605 = vmatpush3.msra.mxu0 %v625_v44  ;;  %v800_v48 = vpop.permute.xlu1 %799 }
 0x861   :  { %2614 = vmatprep.subr.msk.mxu0 %vm509_vm2, %v802_v47 }
 0x864   :  { %v796_v54 = vpop.permute.xlu0 %795 }
 0x868   :  { %v1090_v58 = vpop.permute.xlu0 %1089 }
 0x86c   :  { %v1084_v60 = vpop.permute.xlu0 %1083 }
 0x89b   :  { %v617_v49 = vpop.xlane.xlu1 %616 }
 0x89c   :  { %2757 = vrcp.f32 %v617_v49 }
 0x89f   :  { %v614_v50 = vpop.xlane.xlu1 %613 }
 0x8a0   :  { %2759 = vrcp.f32 %v614_v50 }
 0x8a3   :  { %v798_v59 = vpop.permute.xlu1 %797 }
 0x8a7   :  { %v1088_v61 = vpop.permute.xlu1 %1087 }
 0x8a9   :  { %v2758_v51 = vpop.eup %2757 }
 0x8aa   :  { %v621_v57 = vmul.f32 %v2758_v51, %v2754_v40 }
 0x8ab   :  { %v1086_v2 = vpop.permute.xlu1 %1085 }
 0x8ad   :  { %v2760_v52 = vpop.eup %2759 }
 0x8ae   :  { %v620_v55 = vmul.f32 %v2760_v52, %v2756_v42 }
 0x8b0   :  { %2606 = vmatprep.mubr.msk.f32.mxu0 %vm599_vm3, %v620_v55 }
 0x8b1   :  { %2607 = vmatmul.mubr.msk.f32.vlgmr.msra.gmra.mxu0 %vm599_vm3, %v621_v57 }
 0x8b2   :  { %2615 = vmatpush3.xpose.msk.msra.mxu0 %vm509_vm2, %v802_v47  ;;  %2618 = vmatprep.mubr.msk.f32.mxu0 %vm509_vm2, %v796_v54 }
 0x8b3   :  { %2616 = vmatprep.subr.msk.mxu0 %vm509_vm2, %v800_v48 }
 0x8b6   :  { %2617 = vmatpush3.xpose.msk.msra.mxu0 %vm509_vm2, %v800_v48 }
 0x8b7   :  { %2633 = vmatprep.subr.msk.mxu0 %vm509_vm2, %v1090_v58 }
 0x8b9   :  { %2619 = vmatmul.mubr.msk.f32.vlgmr.msra.gmra.mxu0 %vm509_vm2, %v798_v59 }
 0x8ba   :  { %2634 = vmatpush3.xpose.msk.msra.mxu0 %vm509_vm2, %v1090_v58  ;;  %2637 = vmatprep.mubr.msk.f32.mxu0 %vm509_vm2, %v1084_v60 }
 0x8bb   :  { %2635 = vmatprep.subr.msk.mxu0 %vm509_vm2, %v1088_v61 }
 0x8be   :  { %2636 = vmatpush3.xpose.msk.msra.mxu0 %vm509_vm2, %v1088_v61 }
 0x8c1   :  { %2638 = vmatmul.mubr.msk.f32.vlgmr.msra.gmra.mxu0 %vm509_vm2, %v1086_v2 }
 0x971   :  { %v2608_v4 = vpop.f32.mrf.mxu0 }
 0x973   :  { %v702_v6 = vpop.f32.mrf.mxu0 }
 0x974   :  { %2611 = vmatprep.mubr.msk.f32.mxu1 %vm509_vm2, %v702_v6 }
 0x975   :  { %2612 = vmatmul.mubr.msk.f32.vlgmr.msra.gmra.mxu1 %vm509_vm2, %v2608_v4 }
 0x979   :  { %v2620_v7 = vpop.f32.mrf.mxu0 }
 0x97a   :  { %v887_v8 = vmul.f32 0.35355338, %v2620_v7  ;;  %v999_v7 = vld [vmem:[%s3541_s4 + $0x8] sm:$0xff] }
 0x97b   :  { %v877_v10 = vpop.f32.mrf.mxu0 }
 0x97c   :  { %v886_v13 = vmul.f32 0.35355338, %v877_v10  ;;  %v889_v23 = vadd.f32 %v887_v8, %v3162_v16 }
 0x97e   :  { %v893_v15 = vsel %vm599_vm3, %v889_v23, -inf  ;;  %v888_v17 = vadd.f32 %v886_v13, %v3164_v19 }
 0x97f   :  { %894 = vmax.xlane.f32.xlu1 %v893_v15 }
 0x980   :  { %v890_v18 = vsel %vm599_vm3, %v888_v17, -inf }
 0x981   :  { %891 = vmax.xlane.f32.xlu0 %v890_v18  ;;  %v2639_v20 = vpop.f32.mrf.mxu0 }
 0x982   :  { %v1175_v25 = vmul.f32 0.35355338, %v2639_v20 }
 0x983   :  { %v1165_v46 = vpop.f32.mrf.mxu0 }
 0x984   :  { %v1177_v26 = vadd.f32 %v1175_v25, %v3162_v16  ;;  %v1174_v47 = vmul.f32 0.35355338, %v1165_v46 }
 0x986   :  { %v1181_v27 = vsel %vm599_vm3, %v1177_v26, -inf  ;;  %v1176_v48 = vadd.f32 %v1174_v47, %v3164_v19  ;;  %v501_v47 = vrot.slane %v3170_v32, %v3073_v63 }
 0x988   :  { %v1178_v49 = vsel %vm599_vm3, %v1176_v48, -inf }
 0x990   :  { %912 = vrot.lane.b32.xlu1 %v3174_v36, %s2915_s18 }
 0x994   :  { %1377 = vrot.lane.b32.xlu1 %v3142_v9, %s2916_s0 }
 0x998   :  { %1375 = vrot.lane.b32.xlu1 %v3148_v12, %s2916_s0 }
 0x99c   :  { %1373 = vrot.lane.b32.xlu1 %v3158_v14, %s2917_s2 }
 0x9c0   :  { %1182 = vmax.xlane.f32.xlu1 %v1181_v27 }
 0x9d1   :  { %1200 = vrot.lane.b32.xlu1 %v3174_v36, %s2918_s19 }
 0xa08   :  { %v895_v29 = vpop.xlane.xlu1 %894 }
 0xa09   :  { %v897_v33 = vsub.f32 %v889_v23, %v895_v29 }
 0xa0a   :  { %v892_v9 = vpop.xlane.xlu0 %891 }
 0xa0b   :  { %v900_v34 = vmul.f32 1.442695, %v897_v33  ;;  %v896_v12 = vsub.f32 %v888_v17, %v892_v9 }
 0xa0c   :  { %v913_v35 = vpop.permute.xlu1 %912 }
 0xa0d   :  { %2761 = vpow2.f32 %v900_v34  ;;  %v898_v37 = vmul.f32 1.442695, %v896_v12 }
 0xa0f   :  { %2763 = vpow2.f32 %v898_v37 }
 0xa10   :  { %v1378_v14 = vpop.permute.xlu1 %1377 }
 0xa11   :  { %2652 = vmatprep.subr.msk.mxu0 %vm509_vm2, %v1378_v14 }
 0xa12   :  { %2653 = vmatpush3.xpose.msk.msra.mxu0 %vm509_vm2, %v1378_v14  ;;  %v1287_v14 = vld [vmem:[%s3541_s4 + $0x10] sm:$0xff] }
 0xa14   :  { %v1376_v1 = vpop.permute.xlu1 %1375 }
 0xa15   :  { %2654 = vmatprep.subr.msk.mxu0 %vm509_vm2, %v1376_v1 }
 0xa16   :  { %2655 = vmatpush3.xpose.msk.msra.mxu0 %vm509_vm2, %v1376_v1 }
 0xa18   :  { %v1374_v41 = vpop.permute.xlu1 %1373 }
 0xa1a   :  { %v2762_v38 = vpop.eup %2761 }
 0xa1b   :  { %v905_v0 = vsel %vm599_vm3, %v2762_v38, 0.0 }
 0xa1c   :  { %v2764_v39 = vpop.eup %2763  ;;  %906 = vadd.xlane.f32.xlu0 %v905_v0 }
 0xa1d   :  { %v902_v40 = vsel %vm599_vm3, %v2764_v39, 0.0 }
 0xa20   :  { %903 = vadd.xlane.f32.xlu0 %v902_v40 }
 0xa35   :  { %v2613_v13 = vpop.f32.mrf.mxu1 }
 0xa36   :  { %914 = vrot.lane.b32.xlu0 %v3176_v31, %s2915_s18 }
 0xa37   :  { %v3249_v25 = vpop.f32.mrf.mxu1 }
 0xa3a   :  { %1371 = vrot.lane.b32.xlu0 %v3144_v11, %s2917_s2 }
 0xa49   :  { %v1183_v42 = vpop.xlane.xlu1 %1182 }
 0xa4a   :  { %v1185_v43 = vsub.f32 %v1177_v26, %v1183_v42 }
 0xa4c   :  { %v1188_v44 = vmul.f32 1.442695, %v1185_v43 }
 0xa4d   :  { %v1201_v34 = vpop.permute.xlu1 %1200 }
 0xa4e   :  { %2765 = vpow2.f32 %v1188_v44 }
 0xa59   :  { %1179 = vmax.xlane.f32.xlu0 %v1178_v49 }
 0xa5b   :  { %v2766_v50 = vpop.eup %2765 }
 0xa5c   :  { %v1193_v51 = vsel %vm599_vm3, %v2766_v50, 0.0 }
 0xa5d   :  { %1194 = vadd.xlane.f32.xlu0 %v1193_v51 }
 0xaa5   :  { %v907_v52 = vpop.xlane.xlu0 %906 }
 0xaa6   :  { %2767 = vrcp.f32 %v907_v52 }
 0xaa9   :  { %v904_v54 = vpop.xlane.xlu0 %903 }
 0xaaa   :  { %2769 = vrcp.f32 %v904_v54 }
 0xaad   :  { %v915_v11 = vpop.permute.xlu0 %914 }
 0xaae   :  { %2621 = vmatprep.subr.mxu1 %v915_v11 }
 0xaaf   :  { %2622 = vmatpush3.msra.mxu1 %v915_v11 }
 0xab0   :  { %2623 = vmatprep.subr.mxu1 %v913_v35 }
 0xab1   :  { %v1372_v55 = vpop.permute.xlu0 %1371  ;;  %2624 = vmatpush3.msra.mxu1 %v913_v35 }
 0xab2   :  { %2656 = vmatprep.mubr.msk.f32.mxu0 %vm509_vm2, %v1372_v55  ;;  %2628 = vmatprep.subr.mxu1 %v999_v7 }
 0xab3   :  { %2657 = vmatmul.mubr.msk.f32.vlgmr.msra.gmra.mxu0 %vm509_vm2, %v1374_v41  ;;  %v2768_v57 = vpop.eup %2767 }
 0xab4   :  { %v911_v60 = vmul.f32 %v2768_v57, %v2762_v38  ;;  %v1575_v57 = vld [vmem:[%s3541_s4 + $0x18] sm:$0xff] }
 0xab7   :  { %v2770_v58 = vpop.eup %2769 }
 0xab8   :  { %v910_v59 = vmul.f32 %v2770_v58, %v2764_v39 }
 0xaba   :  { %2625 = vmatprep.mubr.msk.f32.mxu1 %vm599_vm3, %v910_v59 }
 0xabb   :  { %2626 = vmatmul.mubr.msk.f32.vlgmr.msra.gmra.mxu1 %vm599_vm3, %v911_v60 }
 0xabc   :  { %2629 = vmatpush3.msra.mxu1 %v999_v7 }
 0xae2   :  { %v1180_v61 = vpop.xlane.xlu0 %1179 }
 0xae3   :  { %v1184_v2 = vsub.f32 %v1176_v48, %v1180_v61  ;;  %v794_v48 = vadd.f32 %v2613_v13, %v501_v47 }
 0xae5   :  { %v1186_v3 = vmul.f32 1.442695, %v1184_v2 }
 0xae6   :  { %v1195_v27 = vpop.xlane.xlu0 %1194 }
 0xae7   :  { %2771 = vpow2.f32 %v1186_v3 }
 0xae8   :  { %2773 = vrcp.f32 %v1195_v27 }
 0xaf4   :  { %v2772_v4 = vpop.eup %2771 }
 0xaf5   :  { %v1190_v6 = vsel %vm599_vm3, %v2772_v4, 0.0 }
 0xaf6   :  { %1191 = vadd.xlane.f32.xlu0 %v1190_v6 }
 0xb0c   :  { %1202 = vrot.lane.b32.xlu0 %v3176_v31, %s2918_s19 }
 0xb73   :  { %v2658_v8 = vpop.f32.mrf.mxu0 }
 0xb74   :  { %v1463_v10 = vmul.f32 0.35355338, %v2658_v8  ;;  %v793_v8 = vadd.f32 %v3249_v25, %v501_v47  ;;  %v1690_v47 = vrot.slane %v3170_v32, %v3019_v22 }
 0xb75   :  { %v1453_v23 = vpop.f32.mrf.mxu0 }
 0xb76   :  { %v1462_v15 = vmul.f32 0.35355338, %v1453_v23  ;;  %v1465_v17 = vadd.f32 %v1463_v10, %v3162_v16 }
 0xb78   :  { %v1469_v18 = vsel %vm599_vm3, %v1465_v17, -inf  ;;  %v1464_v20 = vadd.f32 %v1462_v15, %v3164_v19  ;;  %v2774_v19 = vpop.eup %2773 }
 0xb79   :  { %1470 = vmax.xlane.f32.xlu0 %v1469_v18  ;;  %v1199_v37 = vmul.f32 %v2774_v19, %v2766_v50 }
 0xb7a   :  { %v1466_v26 = vsel %vm599_vm3, %v1464_v20, -inf }
 0xb7b   :  { %v2627_v29 = vpop.f32.mrf.mxu1  ;;  %1467 = vmax.xlane.f32.xlu1 %v1466_v26 }
 0xb7d   :  { %v990_v33 = vpop.f32.mrf.mxu1 }
 0xb7e   :  { %2630 = vmatprep.mubr.msk.f32.mxu1 %vm509_vm2, %v990_v33 }
 0xb7f   :  { %2631 = vmatmul.mubr.msk.f32.vlgmr.msra.gmra.mxu1 %vm509_vm2, %v2627_v29  ;;  %v1192_v9 = vpop.xlane.xlu0 %1191 }
 0xb80   :  { %2775 = vrcp.f32 %v1192_v9 }
 0xb83   :  { %v1203_v16 = vpop.permute.xlu0 %1202 }
 0xb84   :  { %2640 = vmatprep.subr.mxu1 %v1203_v16 }
 0xb85   :  { %2641 = vmatpush3.msra.mxu1 %v1203_v16 }
 0xb86   :  { %2642 = vmatprep.subr.mxu1 %v1201_v34 }
 0xb87   :  { %2643 = vmatpush3.msra.mxu1 %v1201_v34 }
 0xb88   :  { %2647 = vmatprep.subr.mxu1 %v1287_v14 }
 0xb8d   :  { %v2776_v12 = vpop.eup %2775 }
 0xb8e   :  { %v1198_v35 = vmul.f32 %v2776_v12, %v2772_v4 }
 0xb90   :  { %2644 = vmatprep.mubr.msk.f32.mxu1 %vm599_vm3, %v1198_v35 }
 0xb91   :  { %2645 = vmatmul.mubr.msk.f32.vlgmr.msra.gmra.mxu1 %vm599_vm3, %v1199_v37  ;;  %v1702_v37 = vld [vmem:[%s3544_s7 + $0x18] sm:$0xff] }
 0xb92   :  { %2648 = vmatpush3.msra.mxu1 %v1287_v14  ;;  %v1701_v14 = vld [vmem:[%s3544_s7 + $0x10] sm:$0xff]  ;;  %2671 = vmatprep.subr.mxu0 %v1702_v37 }
 0xb93   :  { %2672 = vmatpush3.msra.mxu0 %v1702_v37 }
 0xb94   :  { %2673 = vmatprep.subr.mxu0 %v1701_v14 }
 0xb95   :  { %2674 = vmatpush3.msra.mxu0 %v1701_v14 }
 0xc02   :  { %v1471_v1 = vpop.xlane.xlu0 %1470 }
 0xc03   :  { %v1473_v38 = vsub.f32 %v1465_v17, %v1471_v1  ;;  %v1700_v1 = vld [vmem:[%s3544_s7 + $0x8] sm:$0xff] }
 0xc04   :  { %v1468_v0 = vpop.xlane.xlu1 %1467  ;;  %2675 = vmatprep.subr.mxu0 %v1700_v1 }
 0xc05   :  { %v1476_v39 = vmul.f32 1.442695, %v1473_v38  ;;  %v1472_v40 = vsub.f32 %v1464_v20, %v1468_v0  ;;  %v1699_v38 = vld [vmem:[%s3544_s7] sm:$0xff]  ;;  %2676 = vmatpush3.msra.mxu0 %v1700_v1  ;;  %v1793_v0 = vrot.slane %v3170_v32, %v3131_v56 }
 0xc06   :  { %2677 = vmatprep.subr.mxu0 %v1699_v38 }
 0xc07   :  { %2777 = vpow2.f32 %v1476_v39  ;;  %v1474_v41 = vmul.f32 1.442695, %v1472_v40  ;;  %2678 = vmatpush3.msra.mxu0 %v1699_v38 }
 0xc09   :  { %2779 = vpow2.f32 %v1474_v41 }
 0xc14   :  { %v2778_v42 = vpop.eup %2777 }
 0xc15   :  { %v1481_v43 = vsel %vm599_vm3, %v2778_v42, 0.0 }
 0xc16   :  { %v2780_v44 = vpop.eup %2779  ;;  %1482 = vadd.xlane.f32.xlu1 %v1481_v43 }
 0xc17   :  { %v1478_v46 = vsel %vm599_vm3, %v2780_v44, 0.0 }
 0xc18   :  { %1479 = vadd.xlane.f32.xlu0 %v1478_v46 }
 0xc27   :  { %1488 = vrot.lane.b32.xlu1 %v3174_v36, %s2919_s23 }
 0xc2e   :  { %1490 = vrot.lane.b32.xlu0 %v3176_v31, %s2919_s23 }
 0xc3f   :  { %v2632_v49 = vpop.f32.mrf.mxu1 }
 0xc40   :  { %v1082_v50 = vadd.f32 %v2632_v49, %v794_v48 }
 0xc41   :  { %v1072_v51 = vpop.f32.mrf.mxu1 }
 0xc42   :  { %v1081_v10 = vadd.f32 %v1072_v51, %v793_v8 }
 0xc51   :  { %v2646_v52 = vpop.f32.mrf.mxu1 }
 0xc53   :  { %v1278_v54 = vpop.f32.mrf.mxu1 }
 0xc54   :  { %2649 = vmatprep.mubr.msk.f32.mxu1 %vm509_vm2, %v1278_v54 }
 0xc55   :  { %2650 = vmatmul.mubr.msk.f32.vlgmr.msra.gmra.mxu1 %vm509_vm2, %v2646_v52  ;;  %v1696_v52 = vrot.slane %v3170_v32, %v3024_v24 }
 0xc9f   :  { %v1483_v11 = vpop.xlane.xlu1 %1482 }
 0xca0   :  { %2781 = vrcp.f32 %v1483_v11 }
 0xca1   :  { %v1480_v55 = vpop.xlane.xlu0 %1479 }
 0xca2   :  { %2783 = vrcp.f32 %v1480_v55 }
 0xca3   :  { %v1489_v31 = vpop.permute.xlu1 %1488 }
 0xca5   :  { %v1491_v36 = vpop.permute.xlu0 %1490 }
 0xca6   :  { %2659 = vmatprep.subr.mxu1 %v1491_v36 }
 0xca7   :  { %2660 = vmatpush3.msra.mxu1 %v1491_v36 }
 0xca8   :  { %2661 = vmatprep.subr.mxu1 %v1489_v31 }
 0xca9   :  { %2662 = vmatpush3.msra.mxu1 %v1489_v31 }
 0xcaa   :  { %2666 = vmatprep.subr.mxu1 %v1575_v57 }
 0xcad   :  { %v2782_v58 = vpop.eup %2781 }
 0xcae   :  { %v1487_v61 = vmul.f32 %v2782_v58, %v2778_v42 }
 0xcaf   :  { %v2784_v59 = vpop.eup %2783 }
 0xcb0   :  { %v1486_v60 = vmul.f32 %v2784_v59, %v2780_v44 }
 0xcb2   :  { %2663 = vmatprep.mubr.msk.f32.mxu1 %vm599_vm3, %v1486_v60 }
 0xcb3   :  { %2664 = vmatmul.mubr.msk.f32.vlgmr.msra.gmra.mxu1 %vm599_vm3, %v1487_v61 }
 0xcb4   :  { %2667 = vmatpush3.msra.mxu1 %v1575_v57 }
 0xd15   :  { %v2651_v2 = vpop.f32.mrf.mxu1 }
 0xd16   :  { %v1370_v3 = vadd.f32 %v2651_v2, %v1082_v50 }
 0xd17   :  { %v1360_v4 = vpop.f32.mrf.mxu1 }
 0xd18   :  { %v1369_v23 = vadd.f32 %v1360_v4, %v1081_v10  ;;  %v1787_v10 = vrot.slane %v3170_v32, %v3126_v53 }
 0xd73   :  { %v2665_v6 = vpop.f32.mrf.mxu1 }
 0xd75   :  { %v1566_v7 = vpop.f32.mrf.mxu1 }
 0xd76   :  { %2668 = vmatprep.mubr.msk.f32.mxu1 %vm509_vm2, %v1566_v7 }
 0xd77   :  { %2669 = vmatmul.mubr.msk.f32.vlgmr.msra.gmra.mxu1 %vm509_vm2, %v2665_v6 }
 0xe37   :  { %v2670_v13 = vpop.f32.mrf.mxu1 }
 0xe38   :  { %v1658_v15 = vadd.f32 %v2670_v13, %v1370_v3  ;;  %v3315_v13 = vand.u32 7, %v3016_v21 }
 0xe39   :  { %v1648_v17 = vpop.f32.mrf.mxu1 }
 0xe3a   :  { %v3276_v18 = vadd.f32 %v1658_v15, %v3095_v28  ;;  %v1657_v20 = vadd.f32 %v1648_v17, %v1369_v23  ;;  %v1822_v23 = vld [vmem:[%s3545_s8] sm:$0x7f]  ;;  %vm1860_vm5 = vcmp.ge.s32.totalorder %v3315_v13, 3  ;;  %vm1881_vm9 = vcmp.ge.s32.totalorder %v3315_v13, 2 }
 0xe3b   :  { %vm1902_vm10 = vcmp.ge.s32.totalorder %v3315_v13, 1  ;;  %vm1931_vm11 = vcmp.lt.s32.totalorder %v3315_v13, 7  ;;  %vm1952_vm13 = vcmp.lt.s32.totalorder %v3315_v13, 6  ;;  %vm1973_vm2 = vcmp.lt.s32.totalorder %v3315_v13, 5 }
 0xe3c   :  { %v3279_v26 = vadd.f32 %v1657_v20, %v3098_v30  ;;  %v1664_v27 = vsel %vm3551_vm0, %v3276_v18, 0.0  ;;  %v1825_v20 = vadd.s32 8, %v3016_v21 }
 0xe3d   :  { %1665 = vadd.xlane.f32.xlu0 %v1664_v27  ;;  %v1853_v27 = vrot.slane %v3170_v32, %v3138_v5 }
 0xe3e   :  { %v1661_v29 = vsel %vm3551_vm0, %v3279_v26, 0.0 }
 0xe3f   :  { %1662 = vadd.xlane.f32.xlu1 %v1661_v29 }
 0xec6   :  { %v1666_v25 = vpop.xlane.xlu0 %1665 }
 0xec7   :  { %v1668_v33 = vmul.f32 0.03125, %v1666_v25 }
 0xec8   :  { %v1663_v9 = vpop.xlane.xlu1 %1662 }
 0xec9   :  { %v1670_v16 = vsub.f32 %v3276_v18, %v1668_v33  ;;  %v1667_v34 = vmul.f32 0.03125, %v1663_v9  ;;  %v3328_v33 = vrot.slane %v1822_v23, %v3024_v24  ;;  %v1871_v9 = vrot.slane %v1822_v23, %v3070_v62 }
 0xecb   :  { %v1669_v28 = vsub.f32 %v3279_v26, %v1667_v34  ;;  %v1672_v19 = vmul.f32 %v1670_v16, %v1670_v16  ;;  %v1892_v34 = vrot.slane %v1822_v23, %v3073_v63 }
 0xecd   :  { %v1676_v30 = vsel %vm3551_vm0, %v1672_v19, 0.0  ;;  %v1671_v12 = vmul.f32 %v1669_v28, %v1669_v28 }
 0xece   :  { %1677 = vadd.xlane.f32.xlu1 %v1676_v30  ;;  %v1913_v30 = vrot.slane %v1822_v23, %v3019_v22 }
 0xecf   :  { %v1673_v35 = vsel %vm3551_vm0, %v1671_v12, 0.0  ;;  %v3344_v12 = vrot.slane %v1822_v23, %v3126_v53 }
 0xed0   :  { %1674 = vadd.xlane.f32.xlu0 %v1673_v35 }
 0xee6   :  { %1795 = vrot.lane.b32.xlu0 %v1793_v0, %s2908_s30 }
 0xf57   :  { %v1678_v39 = vpop.xlane.xlu1 %1677 }
 0xf58   :  { %v1680_v40 = vmul.f32 0.03125, %v1678_v39 }
 0xf59   :  { %v1675_v41 = vpop.xlane.xlu0 %1674 }
 0xf5a   :  { %v1682_v42 = vadd.f32 1e-05, %v1680_v40  ;;  %v1679_v43 = vmul.f32 0.03125, %v1675_v41  ;;  %v1963_v40 = vrot.slane %v1822_v23, %v3131_v56  ;;  %v3358_v41 = vrot.slane %v1822_v23, %v3138_v5 }
 0xf5c   :  { %2785 = vrsqrt.f32 %v1682_v42  ;;  %v1681_v44 = vadd.f32 1e-05, %v1679_v43 }
 0xf5d   :  { %v1796_v36 = vpop.permute.xlu0 %1795 }
 0xf5e   :  { %2787 = vrsqrt.f32 %v1681_v44 }
 0xf69   :  { %v2786_v46 = vpop.eup %2785 }
 0xf6a   :  { %v1686_v48 = vmul.f32 %v2786_v46, %v1670_v16 }
 0xf6b   :  { %v2788_v49 = vpop.eup %2787 }
 0xf6c   :  { %v1685_v50 = vmul.f32 %v2788_v49, %v1669_v28  ;;  %v1692_v51 = vmul.f32 %v1690_v47, %v1686_v48  ;;  %v3337_v28 = vand.u32 7, %v1825_v20 }
 0xf6e   :  { %v1691_v54 = vmul.f32 %v1690_v47, %v1685_v50  ;;  %v1698_v55 = vadd.f32 %v1696_v52, %v1692_v51  ;;  %vm1861_vm15 = vcmp.ge.s32.totalorder %v3337_v28, 3  ;;  %vm1882_vm3 = vcmp.ge.s32.totalorder %v3337_v28, 2 }
 0xf6f   :  { %vm1903_vm1 = vcmp.ge.s32.totalorder %v3337_v28, 1 }
 0xf70   :  { %v1697_v11 = vadd.f32 %v1696_v52, %v1691_v54 }
 0xf72   :  { %2679 = vmatprep.mubr.msk.f32.mxu0 %vm3551_vm0, %v1697_v11 }
 0xf73   :  { %2680 = vmatmul.mubr.msk.f32.vlgmr.msra.gmra.mxu0 %vm3551_vm0, %v1698_v55  ;;  %vm1932_vm0 = vcmp.lt.s32.totalorder %v3337_v28, 7 }
0x1033   :  { %v2681_v31 = vpop.f32.mrf.mxu0 }
0x1034   :  { %v1799_v57 = vadd.f32 %v2681_v31, %v1796_v36  ;;  %v1789_v29 = vadd.f32 %v2681_v31, %v1787_v10 }
0x1035   :  { %v1775_v58 = vpop.f32.mrf.mxu0 }
0x1036   :  { %v2451_v59 = vmul.f32 -1.442695, %v1799_v57  ;;  %v1798_v60 = vadd.f32 %v1796_v36, %v1775_v58  ;;  %v1788_v15 = vadd.f32 %v1787_v10, %v1775_v58 }
0x1038   :  { %v2450_v61 = vmul.f32 -1.442695, %v1798_v60  ;;  %2789 = vpow2.f32 %v2451_v59 }
0x103a   :  { %2791 = vpow2.f32 %v2450_v61 }
0x1045   :  { %v2790_v2 = vpop.eup %2789 }
0x1046   :  { %v1807_v6 = vadd.f32 1.0, %v2790_v2 }
0x1047   :  { %v2792_v3 = vpop.eup %2791 }
0x1048   :  { %v1806_v4 = vadd.f32 1.0, %v2792_v3 }
0x104a   :  { %2793 = vrcp.f32 %v1806_v4 }
0x104b   :  { %2795 = vrcp.f32 %v1807_v6 }
0x1057   :  { %v2794_v7 = vpop.eup %2793 }
0x1058   :  { %1814 = vrot.lane.b32.xlu1 %v2794_v7, %s2909_s3  ;;  %v2796_v8 = vpop.eup %2795 }
0x105c   :  { %1816 = vrot.lane.b32.xlu1 %v2796_v8, %s2909_s3 }
0x10ca   :  { %v1815_v17 = vpop.permute.xlu1 %1814 }
0x10cb   :  { %v3323_v25 = vmul.f32 %v1815_v17, %v1788_v15 }
0x10cd   :  { %v1855_v35 = vrot.slane %v3323_v25, 5  ;;  %v1876_v37 = vrot.slane %v3323_v25, 6  ;;  %v1897_v14 = vrot.slane %v3323_v25, 7  ;;  %v1926_v46 = vrot.slane %v3323_v25, 1 }
0x10ce   :  { %v1817_v16 = vpop.permute.xlu1 %1816  ;;  %v1947_v52 = vrot.slane %v3323_v25, 2  ;;  %v1968_v59 = vrot.slane %v3323_v25, 3  ;;  %v1922_v17 = vmul.f32 %v3328_v33, %v3323_v25 }
0x10cf   :  { %v3339_v19 = vmul.f32 %v1817_v16, %v1789_v29 }
0x10d1   :  { %v1856_v1 = vrot.slane %v3339_v19, 5  ;;  %v1877_v38 = vrot.slane %v3339_v19, 6  ;;  %v1898_v0 = vrot.slane %v3339_v19, 7  ;;  %v1927_v39 = vrot.slane %v3339_v19, 1 }
0x10d2   :  { %v1948_v50 = vrot.slane %v3339_v19, 2  ;;  %v1969_v31 = vrot.slane %v3339_v19, 3 }
0x10d3   :  { %v1859_v42 = vsel %vm1857_vm4, %v1856_v1, %v1855_v35  ;;  %v1880_v43 = vsel %vm1878_vm6, %v1877_v38, %v1876_v37  ;;  %v1901_v44 = vsel %vm1899_vm7, %v1898_v0, %v1897_v14  ;;  %v1929_v49 = vsel %vm1928_vm8, %v1926_v46, %v1927_v39 }
0x10d4   :  { %v1866_v47 = vsel %vm1860_vm5, %v1859_v42, 0.0  ;;  %v1887_v5 = vsel %vm1881_vm9, %v1880_v43, 0.0  ;;  %v1908_v51 = vsel %vm1902_vm10, %v1901_v44, 0.0  ;;  %v1858_v54 = vsel %vm1857_vm4, %v1855_v35, %v1856_v1 }
0x10d5   :  { %v1872_v48 = vmul.f32 %v1871_v9, %v1866_v47  ;;  %v1879_v11 = vsel %vm1878_vm6, %v1876_v37, %v1877_v38  ;;  %v1893_v36 = vmul.f32 %v1892_v34, %v1887_v5  ;;  %v1867_v57 = vsel %vm1861_vm15, %v1858_v54, 0.0 }
0x10d6   :  { %v1937_v58 = vsel %vm1931_vm11, %v1929_v49, 0.0  ;;  %v1873_v60 = vmul.f32 %v1871_v9, %v1867_v57  ;;  %v1888_v61 = vsel %vm1882_vm3, %v1879_v11, 0.0  ;;  %v1914_v3 = vmul.f32 %v1913_v30, %v1908_v51  ;;  %v2044_v57 = vld [vmem:[%s3546_s9 + $0x18] sm:$0xff] }
0x10d7   :  { %v1874_v55 = vadd.f32 %v1872_v48, %v1853_v27  ;;  %v1950_v4 = vsel %vm1949_vm12, %v1947_v52, %v1948_v50  ;;  %v1900_v6 = vsel %vm1899_vm7, %v1897_v14, %v1898_v0  ;;  %v1894_v8 = vmul.f32 %v1892_v34, %v1888_v61  ;;  %2682 = vmatprep.subr.mxu1 %v2044_v57 }
0x10d8   :  { %v1875_v7 = vadd.f32 %v1873_v60, %v1853_v27  ;;  %v1909_v10 = vsel %vm1903_vm1, %v1900_v6, 0.0  ;;  %v1930_v23 = vsel %vm1928_vm8, %v1927_v39, %v1926_v46  ;;  %v1971_v20 = vsel %vm1970_vm14, %v1968_v59, %v1969_v31  ;;  %2683 = vmatpush3.msra.mxu1 %v2044_v57  ;;  %v2041_v60 = vld [vmem:[%s3546_s9] sm:$0xff] }
0x10d9   :  { %v1895_v2 = vadd.f32 %v1893_v36, %v1874_v55  ;;  %vm1953_vm4 = vcmp.lt.s32.totalorder %v3337_v28, 6  ;;  %v1958_v29 = vsel %vm1952_vm13, %v1950_v4, 0.0  ;;  %v1915_v9 = vmul.f32 %v1913_v30, %v1909_v10 }
0x10da   :  { %v1896_v27 = vadd.f32 %v1894_v8, %v1875_v7  ;;  %v1951_v16 = vsel %vm1949_vm12, %v1948_v50, %v1947_v52  ;;  %v1943_v35 = vmul.f32 %v3344_v12, %v1937_v58  ;;  %v1938_v37 = vsel %vm1932_vm0, %v1930_v23, 0.0  ;;  %v2043_v58 = vld [vmem:[%s3546_s9 + $0x10] sm:$0xff] }
0x10db   :  { %v1916_v15 = vadd.f32 %v1914_v3, %v1895_v2  ;;  %vm1974_vm1 = vcmp.lt.s32.totalorder %v3337_v28, 5  ;;  %v1979_v25 = vsel %vm1973_vm2, %v1971_v20, 0.0  ;;  %v1923_v1 = vmul.f32 %v3328_v33, %v3339_v19  ;;  %2684 = vmatprep.subr.mxu1 %v2043_v58  ;;  %v3440_v8 = vld [vmem:[#allocation7 + $0x10] sm:$0x3f] }
0x10dc   :  { %v1917_v14 = vadd.f32 %v1915_v9, %v1896_v27  ;;  %v1972_v30 = vsel %vm1970_vm14, %v1969_v31, %v1968_v59  ;;  %v1964_v0 = vmul.f32 %v1963_v40, %v1958_v29  ;;  %v1959_v39 = vsel %vm1953_vm4, %v1951_v16, 0.0  ;;  %v2042_v59 = vld [vmem:[%s3546_s9 + $0x8] sm:$0xff]  ;;  %2685 = vmatpush3.msra.mxu1 %v2043_v58 }
0x10dd   :  { %v1924_v34 = vadd.f32 %v1922_v17, %v1916_v15  ;;  %v1944_v43 = vmul.f32 %v3344_v12, %v1938_v37  ;;  %v1985_v46 = vmul.f32 %v3358_v41, %v1979_v25  ;;  %v1980_v28 = vsel %vm1974_vm1, %v1972_v30, 0.0  ;;  %2686 = vmatprep.subr.mxu1 %v2042_v59 }
0x10de   :  { %v1925_v42 = vadd.f32 %v1923_v1, %v1917_v14  ;;  %v1965_v13 = vmul.f32 %v1963_v40, %v1959_v39  ;;  %v1986_v49 = vmul.f32 %v3358_v41, %v1980_v28  ;;  %vm3552_vm0 = vcmask 261120   ;;  %2687 = vmatpush3.msra.mxu1 %v2042_v59 }
0x10df   :  { %v1945_v38 = vadd.f32 %v1943_v35, %v1924_v34  ;;  %vm3553_vm5 = vmmov %vm3552_vm0  ;;  %2688 = vmatprep.subr.mxu1 %v2041_v60  ;;  %v2018_v10 = vrot.slane %v3170_v32, %v478_v45  ;;  %v2024_v17 = vrot.slane %v3440_v8, %v3070_v62 }
0x10e0   :  { %v1946_v47 = vadd.f32 %v1944_v43, %v1925_v42  ;;  %vm3554_vm6 = vmmov %vm3552_vm0  ;;  %2689 = vmatpush3.msra.mxu1 %v2041_v60 }
0x10e1   :  { %v1966_v44 = vadd.f32 %v1964_v0, %v1945_v38  ;;  %vm3555_vm7 = vmmov %vm3552_vm0  ;;  %v2131_v38 = vrot.slane %v3440_v8, %v3073_v63 }
0x10e2   :  { %v1967_v48 = vadd.f32 %v1965_v13, %v1946_v47  ;;  %vm3556_vm8 = vmmov %vm3552_vm0 }
0x10e3   :  { %v1987_v5 = vadd.f32 %v1985_v46, %v1966_v44  ;;  %vm3557_vm9 = vmmov %vm3552_vm0 }
0x10e4   :  { %v1988_v19 = vadd.f32 %v1986_v49, %v1967_v48  ;;  %vm3558_vm10 = vmmov %vm3552_vm0 }
0x10e5   :  { %v1989_v33 = vsel %vm3552_vm0, %v1987_v5, 0.0  ;;  %vm3559_vm11 = vmmov %vm3552_vm0 }
0x10e6   :  { %1990 = vadd.xlane.f32.xlu1 %v1989_v33  ;;  %v1992_v50 = vsel %vm3553_vm5, %v1988_v19, 0.0  ;;  %vm3560_vm12 = vmmov %vm3552_vm0 }
0x10e7   :  { %1993 = vadd.xlane.f32.xlu0 %v1992_v50  ;;  %vm3561_vm13 = vmmov %vm3552_vm0 }
0x10e8   :  { %vm3562_vm14 = vmmov %vm3552_vm0 }
0x10e9   :  { %vm3563_vm15 = vmmov %vm3552_vm0 }
0x10ea   :  { %vm3564_vm2 = vmmov %vm3552_vm0 }
0x10eb   :  { %vm3565_vm3 = vmmov %vm3552_vm0 }
0x10ec   :  { %vm3566_vm4 = vmmov %vm3552_vm0 }
0x10ed   :  { %vm3567_vm1 = vmmov %vm3552_vm0  ;;  %vm3568_vm0 = vcmask 523264  }
0x10ee   :  { %vm3569_vm5 = vmmov %vm3568_vm0 }
0x116f   :  { %v1991_v51 = vpop.xlane.xlu1 %1990 }
0x1170   :  { %v1995_v52 = vmul.f32 0.03125, %v1991_v51  ;;  %v1994_v54 = vpop.xlane.xlu0 %1993 }
0x1171   :  { %v1996_v11 = vmul.f32 0.03125, %v1994_v54 }
0x1172   :  { %v1997_v12 = vsub.f32 %v1987_v5, %v1995_v52 }
0x1173   :  { %v1998_v36 = vsub.f32 %v1988_v19, %v1996_v11 }
0x1174   :  { %v1999_v55 = vmul.f32 %v1997_v12, %v1997_v12 }
0x1175   :  { %v2000_v31 = vmul.f32 %v1998_v36, %v1998_v36 }
0x1176   :  { %v2001_v40 = vsel %vm3554_vm6, %v1999_v55, 0.0  ;;  %vm3570_vm6 = vmmov %vm3567_vm1 }
0x1177   :  { %2002 = vadd.xlane.f32.xlu0 %v2001_v40  ;;  %v2004_v41 = vsel %vm3555_vm7, %v2000_v31, 0.0  ;;  %vm3571_vm7 = vmmov %vm3567_vm1 }
0x117b   :  { %2005 = vadd.xlane.f32.xlu0 %v2004_v41  ;;  %v2169_v41 = vrot.slane %v3440_v8, %v3024_v24 }
0x1200   :  { %v2003_v61 = vpop.xlane.xlu0 %2002 }
0x1201   :  { %v2007_v2 = vmul.f32 0.03125, %v2003_v61 }
0x1203   :  { %v2009_v3 = vadd.f32 1e-05, %v2007_v2 }
0x1204   :  { %v2006_v4 = vpop.xlane.xlu0 %2005 }
0x1205   :  { %2797 = vrsqrt.f32 %v2009_v3  ;;  %v2008_v6 = vmul.f32 0.03125, %v2006_v4 }
0x1207   :  { %v2010_v7 = vadd.f32 1e-05, %v2008_v6 }
0x1209   :  { %2799 = vrsqrt.f32 %v2010_v7 }
0x1212   :  { %v2798_v23 = vpop.eup %2797 }
0x1213   :  { %v2013_v15 = vmul.f32 %v2798_v23, %v1997_v12 }
0x1215   :  { %v2019_v20 = vmul.f32 %v2018_v10, %v2013_v15 }
0x1216   :  { %v2800_v29 = vpop.eup %2799 }
0x1217   :  { %v2014_v27 = vmul.f32 %v2800_v29, %v1998_v36  ;;  %v2025_v9 = vadd.f32 %v2024_v17, %v2019_v20  ;;  %v2163_v36 = vrot.slane %v3440_v8, %v3019_v22 }
0x1219   :  { %v2020_v16 = vmul.f32 %v2018_v10, %v2014_v27  ;;  %v2452_v34 = vmul.f32 -1.442695, %v2025_v9  ;;  %v2213_v27 = vld [vmem:[%s3547_s10 + $0x18] sm:$0xff] }
0x121a   :  { %2693 = vmatprep.subr.mxu0 %v2213_v27 }
0x121b   :  { %v2026_v35 = vadd.f32 %v2024_v17, %v2020_v16  ;;  %2801 = vpow2.f32 %v2452_v34  ;;  %2694 = vmatpush3.msra.mxu0 %v2213_v27  ;;  %v2211_v16 = vld [vmem:[%s3547_s10 + $0x8] sm:$0xff]  ;;  %v2210_v34 = vld [vmem:[%s3547_s10] sm:$0xff] }
0x121d   :  { %v2453_v37 = vmul.f32 -1.442695, %v2026_v35 }
0x121f   :  { %2803 = vpow2.f32 %v2453_v37  ;;  %v2303_v37 = vld [vmem:[%s3548_s11 + $0x30] sm:$0xff] }
0x1228   :  { %v2802_v25 = vpop.eup %2801 }
0x1229   :  { %v2033_v14 = vadd.f32 1.0, %v2802_v25  ;;  %v2302_v25 = vld [vmem:[%s3548_s11 + $0x28] sm:$0xff] }
0x122b   :  { %2805 = vrcp.f32 %v2033_v14  ;;  %v2301_v14 = vld [vmem:[%s3548_s11 + $0x20] sm:$0xff] }
0x122c   :  { %v2804_v21 = vpop.eup %2803 }
0x122d   :  { %v2034_v45 = vadd.f32 1.0, %v2804_v21  ;;  %v2300_v21 = vld [vmem:[%s3548_s11 + $0x18] sm:$0xff] }
0x122f   :  { %2807 = vrcp.f32 %v2034_v45 }
0x1238   :  { %v2806_v32 = vpop.eup %2805 }
0x1239   :  { %v2039_v1 = vmul.f32 %v2806_v32, %v2025_v9  ;;  %v2212_v9 = vld [vmem:[%s3547_s10 + $0x10] sm:$0xff] }
0x123a   :  { %2695 = vmatprep.subr.mxu0 %v2212_v9 }
0x123b   :  { %2690 = vmatprep.mubr.msk.f32.mxu1 %vm3556_vm8, %v2039_v1  ;;  %2696 = vmatpush3.msra.mxu0 %v2212_v9 }
0x123c   :  { %v2808_v62 = vpop.eup %2807  ;;  %2697 = vmatprep.subr.mxu0 %v2211_v16 }
0x123d   :  { %v2040_v30 = vmul.f32 %v2808_v62, %v2026_v35  ;;  %2698 = vmatpush3.msra.mxu0 %v2211_v16  ;;  %v2304_v35 = vld [vmem:[%s3548_s11 + $0x38] sm:$0xff] }
0x123e   :  { %2699 = vmatprep.subr.mxu0 %v2210_v34  ;;  %2704 = vmatprep.subr.mxu1 %v2304_v35 }
0x123f   :  { %2691 = vmatmul.mubr.msk.f32.vlgmr.msra.gmra.mxu1 %vm3557_vm9, %v2040_v30  ;;  %2700 = vmatpush3.msra.mxu0 %v2210_v34 }
0x1240   :  { %2705 = vmatpush3.msra.mxu1 %v2304_v35 }
0x1241   :  { %2706 = vmatprep.subr.mxu1 %v2303_v37 }
0x1242   :  { %2707 = vmatpush3.msra.mxu1 %v2303_v37 }
0x1243   :  { %2708 = vmatprep.subr.mxu1 %v2302_v25 }
0x1244   :  { %2709 = vmatpush3.msra.mxu1 %v2302_v25 }
0x1245   :  { %2710 = vmatprep.subr.mxu1 %v2301_v14 }
0x1246   :  { %2711 = vmatpush3.msra.mxu1 %v2301_v14 }
0x1247   :  { %2712 = vmatprep.subr.mxu1 %v2300_v21 }
0x1248   :  { %2713 = vmatpush3.msra.mxu1 %v2300_v21 }
0x12ff   :  { %v2692_v0 = vpop.f32.mrf.mxu1 }
0x1300   :  { %v2127_v39 = vadd.f32 %v2692_v0, %v3276_v18 }
0x1301   :  { %v2117_v42 = vpop.f32.mrf.mxu1 }
0x1302   :  { %v3452_v43 = vadd.f32 %v2131_v38, %v2127_v39  ;;  %v2126_v44 = vadd.f32 %v2117_v42, %v3279_v26  ;;  %v2201_v39 = vrot.slane %v3440_v8, %v3126_v53  ;;  %v2298_v53 = vld [vmem:[%s3548_s11 + $0x8] sm:$0xff] }
0x1304   :  { %v3455_v46 = vadd.f32 %v2131_v38, %v2126_v44  ;;  %v2137_v28 = vsel %vm3558_vm10, %v3452_v43, 0.0 }
0x1305   :  { %2138 = vadd.xlane.f32.xlu0 %v2137_v28 }
0x1306   :  { %v2134_v47 = vsel %vm3559_vm11, %v3455_v46, 0.0 }
0x1307   :  { %2135 = vadd.xlane.f32.xlu1 %v2134_v47 }
0x138e   :  { %v2139_v13 = vpop.xlane.xlu0 %2138 }
0x138f   :  { %v2141_v63 = vmul.f32 0.03125, %v2139_v13  ;;  %v2207_v13 = vrot.slane %v3440_v8, %v3131_v56  ;;  %v2297_v56 = vld [vmem:[%s3548_s11] sm:$0xff] }
0x1390   :  { %v2136_v5 = vpop.xlane.xlu1 %2135 }
0x1391   :  { %v2143_v18 = vsub.f32 %v3452_v43, %v2141_v63  ;;  %v2140_v48 = vmul.f32 0.03125, %v2136_v5 }
0x1393   :  { %v2142_v49 = vsub.f32 %v3455_v46, %v2140_v48  ;;  %v2145_v33 = vmul.f32 %v2143_v18, %v2143_v18  ;;  %v2299_v48 = vld [vmem:[%s3548_s11 + $0x10] sm:$0xff]  ;;  %s2920_s11 = smov [#allocation8]  }
0x1394   :  { %2714 = vmatprep.subr.mxu1 %v2299_v48  ;;  %s2397_s0 = sshll.u32 %s2920_s11, 4  ;;  %s2398_s0 = int_to_ptr.vmem [resolvable:$true] %s2397_s0 }
0x1395   :  { %v2149_v26 = vsel %vm3560_vm12, %v2145_v33, 0.0  ;;  %v2144_v19 = vmul.f32 %v2142_v49, %v2142_v49  ;;  %2715 = vmatpush3.msra.mxu1 %v2299_v48  ;;  %s2877_s2 = scalar_lea.vmem %s2398_s0, 256  ;;  %p2882_p2 = scmp.lt.s32.totalorder %s2398_s0, %s2398_s0 }
0x1396   :  { %2150 = vadd.xlane.f32.xlu0 %v2149_v26  ;;  %2716 = vmatprep.subr.mxu1 %v2298_v53  ;;  %p2878_p1 = scmp.ne.s32.totalorder %s2398_s0, %s2877_s2  ;;  %p2883_p3 = scmp.lt.s32.totalorder %s2877_s2, %s2877_s2 }
0x1397   :  { %v2146_v50 = vsel %vm3561_vm13, %v2144_v19, 0.0  ;;  %2717 = vmatpush3.msra.mxu1 %v2298_v53 }
0x1398   :  { %2147 = vadd.xlane.f32.xlu1 %v2146_v50  ;;  %2718 = vmatprep.subr.mxu1 %v2297_v56  ;;  %p2884_p4 = por %p2883_p3, %p2882_p2 }
0x1399   :  { %2719 = vmatpush3.msra.mxu1 %v2297_v56 }
0x139a   :  { %p2885_p5 = pnand %p2884_p4, %p2878_p1 }
0x141f   :  { %v2151_v51 = vpop.xlane.xlu0 %2150 }
0x1420   :  { %v2153_v52 = vmul.f32 0.03125, %v2151_v51 }
0x1421   :  { %v2148_v12 = vpop.xlane.xlu1 %2147 }
0x1422   :  { %v2155_v54 = vadd.f32 1e-05, %v2153_v52  ;;  %v2152_v11 = vmul.f32 0.03125, %v2148_v12 }
0x1424   :  { %2809 = vrsqrt.f32 %v2155_v54  ;;  %v2154_v55 = vadd.f32 1e-05, %v2152_v11 }
0x1426   :  { %2811 = vrsqrt.f32 %v2154_v55 }
0x1431   :  { %v2810_v40 = vpop.eup %2809 }
0x1432   :  { %v2159_v31 = vmul.f32 %v2810_v40, %v2143_v18 }
0x1433   :  { %v2812_v57 = vpop.eup %2811 }
0x1434   :  { %v2165_v58 = vmul.f32 %v2163_v36, %v2159_v31  ;;  %v2158_v59 = vmul.f32 %v2812_v57, %v2142_v49 }
0x1436   :  { %v3469_v60 = vadd.f32 %v2169_v41, %v2165_v58  ;;  %v2164_v61 = vmul.f32 %v2163_v36, %v2158_v59 }
0x1438   :  { %v2175_v2 = vsel %vm3562_vm14, %v3469_v60, 0.0  ;;  %v3473_v3 = vadd.f32 %v2169_v41, %v2164_v61 }
0x1439   :  { %2176 = vadd.xlane.f32.xlu0 %v2175_v2 }
0x143a   :  { %v2172_v22 = vsel %vm3563_vm15, %v3473_v3, 0.0 }
0x143b   :  { %2173 = vadd.xlane.f32.xlu1 %v2172_v22 }
0x14c2   :  { %v2177_v4 = vpop.xlane.xlu0 %2176 }
0x14c3   :  { %v2179_v6 = vmul.f32 0.03125, %v2177_v4 }
0x14c4   :  { %v2174_v7 = vpop.xlane.xlu1 %2173 }
0x14c5   :  { %v2181_v24 = vsub.f32 %v3469_v60, %v2179_v6  ;;  %v2178_v10 = vmul.f32 0.03125, %v2174_v7 }
0x14c7   :  { %v2180_v23 = vsub.f32 %v3473_v3, %v2178_v10  ;;  %v2183_v15 = vmul.f32 %v2181_v24, %v2181_v24 }
0x14c9   :  { %v2187_v17 = vsel %vm3564_vm2, %v2183_v15, 0.0  ;;  %v2182_v20 = vmul.f32 %v2180_v23, %v2180_v23 }
0x14ca   :  { %2188 = vadd.xlane.f32.xlu0 %v2187_v17 }
0x14cb   :  { %v2184_v29 = vsel %vm3565_vm3, %v2182_v20, 0.0 }
0x14cc   :  { %2185 = vadd.xlane.f32.xlu1 %v2184_v29 }
0x1553   :  { %v2189_v45 = vpop.xlane.xlu0 %2188 }
0x1554   :  { %v2191_v32 = vmul.f32 0.03125, %v2189_v45 }
0x1555   :  { %v2186_v1 = vpop.xlane.xlu1 %2185 }
0x1556   :  { %v2193_v62 = vadd.f32 1e-06, %v2191_v32  ;;  %v2190_v30 = vmul.f32 0.03125, %v2186_v1 }
0x1558   :  { %2813 = vrsqrt.f32 %v2193_v62  ;;  %v2192_v38 = vadd.f32 1e-06, %v2190_v30 }
0x155a   :  { %2815 = vrsqrt.f32 %v2192_v38 }
0x1565   :  { %v2814_v0 = vpop.eup %2813 }
0x1566   :  { %v2197_v42 = vmul.f32 %v2814_v0, %v2181_v24 }
0x1567   :  { %v2816_v44 = vpop.eup %2815 }
0x1568   :  { %v2196_v28 = vmul.f32 %v2816_v44, %v2180_v23  ;;  %v2203_v47 = vmul.f32 %v2201_v39, %v2197_v42 }
0x156a   :  { %v2202_v63 = vmul.f32 %v2201_v39, %v2196_v28  ;;  %v2209_v18 = vadd.f32 %v2207_v13, %v2203_v47 }
0x156c   :  { %v2208_v5 = vadd.f32 %v2207_v13, %v2202_v63 }
0x156e   :  { %2701 = vmatprep.mubr.msk.f32.mxu0 %vm3566_vm4, %v2208_v5 }
0x156f   :  { %2702 = vmatmul.mubr.msk.f32.vlgmr.msra.gmra.mxu0 %vm3567_vm1, %v2209_v18 }
0x162f   :  { %v2703_v8 = vpop.f32.mrf.mxu0 }
0x1630   :  { %v2296_v26 = vmax.f32 %v2703_v8, 0.0 }
0x1631   :  { %v2286_v49 = vpop.f32.mrf.mxu0 }
0x1632   :  { %v2295_v33 = vmax.f32 %v2286_v49, 0.0 }
0x1634   :  { %2720 = vmatprep.mubr.msk.f32.mxu1 %vm3568_vm0, %v2295_v33 }
0x1635   :  { %2721 = vmatmul.mubr.msk.f32.vlgmr.msra.gmra.mxu1 %vm3569_vm5, %v2296_v26 }
0x16f5   :  { %v2722_v19 = vpop.f32.mrf.mxu1 }
0x16f6   :  { %v2383_v50 = vadd.f32 %v2722_v19, %v3469_v60 }
0x16f7   :  { %v2377_v51 = vpop.f32.mrf.mxu1 }
0x16f8   :  { %v2387_v52 = vmul.f32 0.5, %v2383_v50  ;;  %v2378_v12 = vadd.f32 %v2377_v51, %v3473_v3 }
0x16fa   :  { %v2389_v54 = vadd.f32 %v2387_v52, %v3452_v43  ;;  %v2386_v11 = vmul.f32 0.5, %v2378_v12 }
0x16fc   :  { %2391 = vst.msk [vmem:[#allocation8 + $0x8] sm:$0xff] %vm3570_vm6, %v2389_v54  ;;  %v2388_v55 = vadd.f32 %v2386_v11, %v3455_v46 }
0x16fe   :  { %2390 = vst.msk [vmem:[#allocation8] sm:$0xff] %vm3571_vm7, %v2388_v55 }
0x16ff   :  { %2888 = shalt.err (!%p2885_p5)
}
0x1700   :  { %2403 = dma.vmem_to_hbm [thread:$0]  %s2398_s0, 256, %s3549_s12, [#allocation4], %s2905_s26, %s2905_s26, %s2906_s27  }
0x1701   :  { %2901 = dma.done.wait [#allocation4], 256  }
0x1702   :  { %2902 = vsyncadd [#allocation4], 4294967040 }
0x1703   :  { %2407 = vsyncpa [#allocation3], 1 }
0x1704   :  { %2408 = vsyncpa [#allocation6], 1 }
0x1705   :  { %2409 = vsyncpa [#allocation4], 1 }

</bundles_post_ra>
